<compile_context>
chip_gen: v6e
topology: v6e:2x2x1
jax: 0.10.0
libtpu: 0.0.40
codegen_flags: <defaults>
</compile_context>

<pallas_src>
import functools

import jax
import jax.numpy as jnp
import numpy as np
from jax import lax
from jax.experimental import pallas as pl
from jax.experimental.pallas import tpu as pltpu


def _tca_kernel(x_ref, w_ref, b_ref, o_ref, *, H, W, C, OC, K_pad):
    """Processes a block of NB batch elements per grid step.

    x_ref : (NB, H, W, C)    NHWC input block (f32)
    w_ref : (K_pad, OC)      im2col conv weight (bf16), rows ordered (dy, dx, c),
                             zero-padded from 9*3C up to K_pad
    b_ref : (1, OC)          conv bias (f32)
    o_ref : (NB, H, W, OC)   NHWC output block (f32)
    """
    NB = x_ref.shape[0]
    C3 = 3 * C           # concatenated channels
    KC = 9 * C3          # un-padded im2col depth

    x = x_ref[...].astype(jnp.float32)                                # (NB,H,W,C)

    # AdaptiveAvgPool2d((1,None)) / ((None,1)) + expand, computed in f32.
    t_att = jnp.broadcast_to(jnp.mean(x, axis=1, keepdims=True), x.shape)
    j_att = jnp.broadcast_to(jnp.mean(x, axis=2, keepdims=True), x.shape)

    # torch.cat([x, out_1, out_2], channel) -> (NB,H,W,3C); cast once to bf16 so
    # the fused matmul runs as a native-bf16 MXU pass (f32 accumulation below).
    feat = jnp.concatenate([x, t_att, j_att], axis=-1).astype(jnp.bfloat16)

    # ---- im2col built in two lane-growing stages (6 slices instead of 9) ----
    # Stage 1: 3-wide column window (padding=1 along W) -> (NB, H, W, 3*3C)
    zc = jnp.zeros((NB, H, 1, C3), jnp.bfloat16)
    fw = jnp.concatenate([zc, feat, zc], axis=2)                      # (NB,H,W+2,3C)
    cols = jnp.concatenate([fw[:, :, dx:dx + W, :] for dx in range(3)],
                           axis=-1)                                   # (NB,H,W,3*3C)
    # Stage 2: 3-tall row window (padding=1 along H) + zero-pad K to K_pad.
    zr = jnp.zeros((NB, 1, W, 3 * C3), jnp.bfloat16)
    fh = jnp.concatenate([zr, cols, zr], axis=1)                      # (NB,H+2,W,3*3C)
    pieces = [fh[:, dy:dy + H, :, :] for dy in range(3)]
    if K_pad > KC:
        pieces.append(jnp.zeros((NB, H, W, K_pad - KC), jnp.bfloat16))
    # Channel order is (dy, dx, c) == w_hwio.reshape(9*3C, OC) row order.
    lhs = jnp.concatenate(pieces, axis=-1).reshape(NB * H * W, K_pad)

    # Single lane-dense MXU matmul (K = K_pad >= 128), f32 accumulation.
    acc = jnp.dot(lhs, w_ref[...], preferred_element_type=jnp.float32)
    acc = acc + b_ref[...]                                            # (1,OC) bcast
    o_ref[...] = acc.reshape(NB, H, W, OC).astype(o_ref.dtype)


def _prep_params(w_hwio, bias):
    """Reshape conv weight to an im2col matrix, pad K to a 128 multiple, cast bf16."""
    kh, kw, c3, oc = w_hwio.shape
    kc = kh * kw * c3
    k_pad = max(128, -(-kc // 128) * 128)
    w = jnp.asarray(w_hwio, jnp.float32).reshape(kc, oc)
    w = jnp.pad(w, ((0, k_pad - kc), (0, 0))).astype(jnp.bfloat16)
    b = jnp.asarray(bias, jnp.float32).reshape(1, oc)
    return w, b, k_pad


def tca_forward_nhwc(x_nhwc, w_hwio, bias, *, batch_block=1):
    """x_nhwc: (N,H,W,C), w_hwio: (3,3,3C,OC), bias: (OC,) -> (N,H,W,OC) f32."""
    N, H, W, C = x_nhwc.shape
    OC = w_hwio.shape[-1]
    assert w_hwio.shape[:3] == (3, 3, 3 * C), w_hwio.shape
    nb = int(batch_block)
    assert N % nb == 0, "batch_block must divide N"

    w2, b2, k_pad = _prep_params(w_hwio, bias)
    kernel = functools.partial(_tca_kernel, H=H, W=W, C=C, OC=OC, K_pad=k_pad)

    # Explicit VMEM budget from the block footprint (matters on v7x's 64 MiB VMEM)
    # and an advisory cost estimate for the XLA scheduler.
    in_blk = nb * H * W * C * 4
    out_blk = nb * H * W * OC * 4
    im2col_blk = nb * H * W * k_pad * 2
    w_bytes = k_pad * OC * 2
    vmem_bytes = int(min(64 * 2**20,
                         max(16 * 2**20,
                             4 * (in_blk + out_blk) + 8 * im2col_blk
                             + w_bytes + (4 << 20))))
    cost = pl.CostEstimate(
        flops=2 * N * H * W * k_pad * OC,
        transcendentals=0,
        bytes_accessed=(N * H * W * C * 4 + w_bytes + OC * 4
                        + N * H * W * OC * 4))

    return pl.pallas_call(
        kernel,
        out_shape=jax.ShapeDtypeStruct((N, H, W, OC), jnp.float32),
        grid=(N // nb,),
        in_specs=[
            pl.BlockSpec((nb, H, W, C), lambda n: (n, 0, 0, 0)),
            pl.BlockSpec((k_pad, OC), lambda n: (0, 0)),
            pl.BlockSpec((1, OC), lambda n: (0, 0)),
        ],
        out_specs=pl.BlockSpec((nb, H, W, OC), lambda n: (n, 0, 0, 0)),
        compiler_params=pltpu.CompilerParams(
            dimension_semantics=("parallel",),
            vmem_limit_bytes=vmem_bytes),
        cost_estimate=cost,
    )(x_nhwc, w2, b2)


def tca_forward_nchw(x_nchw, w_hwio, bias, *, batch_block=1):
    """PyTorch-convention (NCHW) wrapper.

    Prefer tca_forward_nhwc and keep the surrounding model in NHWC: at these
    shapes the two layout transposes below can cost as much as the kernel.
    """
    x_nhwc = jnp.transpose(x_nchw, (0, 2, 3, 1))
    out = tca_forward_nhwc(x_nhwc, w_hwio, bias, batch_block=batch_block)
    return jnp.transpose(out, (0, 3, 1, 2))


def _reference_nhwc(x_nhwc, w_hwio, bias):
    """Pure-JAX f32 reference of the TCA forward (NHWC)."""
    t_att = jnp.broadcast_to(jnp.mean(x_nhwc, axis=1, keepdims=True), x_nhwc.shape)
    j_att = jnp.broadcast_to(jnp.mean(x_nhwc, axis=2, keepdims=True), x_nhwc.shape)
    feat = jnp.concatenate([x_nhwc, t_att, j_att], axis=-1)
    out = lax.conv_general_dilated(
        feat, w_hwio, window_strides=(1, 1), padding="SAME",
        dimension_numbers=("NHWC", "HWIO", "NHWC"),
        preferred_element_type=jnp.float32)
    return out + bias


if __name__ == "__main__":
    # Small shapes consistent with the module: in_ch=4, spatial 16x16, batch 2.
    N, C, H, W = 2, 4, 16, 16
    OC = 256

    key = jax.random.PRNGKey(0)
    kx, kw, kb = jax.random.split(key, 3)

    # PyTorch-shaped input (NCHW) for parity with the nn.Module spec; the kernel
    # consumes NHWC (single upfront layout conversion, no per-call transposes).
    x_nchw = jax.random.normal(kx, (N, C, H, W), dtype=jnp.float32)
    x_nhwc = jnp.transpose(x_nchw, (0, 2, 3, 1))

    # Conv2d(3C, 256, k=3) parameters, deterministic synthetic init (HWIO layout).
    fan_in = 3 * C * 3 * 3
    bound = 1.0 / np.sqrt(fan_in)
    w_hwio = jax.random.uniform(kw, (3, 3, 3 * C, OC), jnp.float32, -bound, bound)
    bias = jax.random.uniform(kb, (OC,), jnp.float32, -bound, bound)

    # Default: one batch element per (parallel) grid step -> both v7x TCs busy.
    out = jax.block_until_ready(tca_forward_nhwc(x_nhwc, w_hwio, bias, batch_block=1))
    assert out.shape == (N, H, W, OC), out.shape

    # Batch-folded variant (single grid step, M=N*H*W) -> best on single-TC v5e/v6e.
    out_folded = jax.block_until_ready(
        tca_forward_nhwc(x_nhwc, w_hwio, bias, batch_block=N))
    np.testing.assert_allclose(np.asarray(out), np.asarray(out_folded),
                               rtol=1e-5, atol=1e-5)

    # Numerical check vs a pure-f32 JAX reference. The kernel uses bf16 MXU
    # operands with f32 accumulation, hence the slightly looser tolerance.
    ref = jax.block_until_ready(_reference_nhwc(x_nhwc, w_hwio, bias))
    np.testing.assert_allclose(np.asarray(out), np.asarray(ref),
                               rtol=2e-2, atol=2e-2)

    # PyTorch-convention (NCHW in / NCHW out) wrapper parity.
    out_nchw = jax.block_until_ready(tca_forward_nchw(x_nchw, w_hwio, bias))
    np.testing.assert_allclose(np.asarray(out_nchw),
                               np.asarray(jnp.transpose(ref, (0, 3, 1, 2))),
                               rtol=2e-2, atol=2e-2)

    print("KERNEL_OK")
</pallas_src>

<mosaic_0001>
module attributes {stable_mosaic.version = 11 : i64} {
  func.func @_tca_kernel(%arg0: i32, %arg1: memref<1x16x16x4xf32, #tpu.memory_space<vmem>>, %arg2: memref<128x256xbf16, #tpu.memory_space<vmem>>, %arg3: memref<1x256xf32, #tpu.memory_space<vmem>>, %arg4: memref<1x16x16x256xf32, #tpu.memory_space<vmem>>) attributes {dimension_semantics = [#tpu.dimension_semantics<parallel>], iteration_bounds = array<i64: 2>, scalar_prefetch = 0 : i64, scratch_operands = 0 : i64, tpu.core_type = #tpu.core_type<tc>, window_params = [{transform_indices = @transform_0, window_bounds = array<i64: 1, 16, 16, 4>}, {pipeline_mode = #tpu.pipeline_mode<synchronous>, transform_indices = @transform_1, window_bounds = array<i64: 128, 256>}, {pipeline_mode = #tpu.pipeline_mode<synchronous>, transform_indices = @transform_2, window_bounds = array<i64: 1, 256>}, {transform_indices = @transform_3, window_bounds = array<i64: 1, 16, 16, 256>}]} {
    %c0 = arith.constant 0 : index
    %c0_0 = arith.constant 0 : index
    %c0_1 = arith.constant 0 : index
    %c0_2 = arith.constant 0 : index
    %0 = vector.load %arg1[%c0, %c0_0, %c0_1, %c0_2] : memref<1x16x16x4xf32, #tpu.memory_space<vmem>>, vector<1x16x16x4xf32>
    %cst = arith.constant dense<0.000000e+00> : vector<1x16x4xf32>
    %1 = vector.multi_reduction <add>, %0, %cst [1] : vector<1x16x16x4xf32> to vector<1x16x4xf32>
    %2 = vector.shape_cast %1 : vector<1x16x4xf32> to vector<1x1x16x4xf32>
    %cst_3 = arith.constant 1.600000e+01 : f32
    %3 = vector.broadcast %cst_3 : f32 to vector<1x1x16x4xf32>
    %4 = arith.divf %2, %3 : vector<1x1x16x4xf32>
    %5 = vector.shape_cast %4 : vector<1x1x16x4xf32> to vector<1x1x16x4xf32>
    %6 = vector.broadcast %5 : vector<1x1x16x4xf32> to vector<1x16x16x4xf32>
    %cst_4 = arith.constant dense<0.000000e+00> : vector<1x16x4xf32>
    %7 = vector.multi_reduction <add>, %0, %cst_4 [2] : vector<1x16x16x4xf32> to vector<1x16x4xf32>
    %8 = vector.shape_cast %7 : vector<1x16x4xf32> to vector<1x16x1x4xf32>
    %cst_5 = arith.constant 1.600000e+01 : f32
    %9 = vector.broadcast %cst_5 : f32 to vector<1x16x1x4xf32>
    %10 = arith.divf %8, %9 : vector<1x16x1x4xf32>
    %11 = vector.shape_cast %10 : vector<1x16x1x4xf32> to vector<1x16x1x4xf32>
    %12 = vector.broadcast %11 : vector<1x16x1x4xf32> to vector<1x16x16x4xf32>
    %13 = tpu.concatenate %0, %6, %12 in 3 : vector<1x16x16x4xf32>, vector<1x16x16x4xf32>, vector<1x16x16x4xf32> -> vector<1x16x16x12xf32>
    %14 = arith.truncf %13 : vector<1x16x16x12xf32> to vector<1x16x16x12xbf16>
    %cst_6 = arith.constant 0.000000e+00 : bf16
    %15 = vector.broadcast %cst_6 : bf16 to vector<1x16x1x12xbf16>
    %16 = tpu.concatenate %15, %14, %15 in 2 : vector<1x16x1x12xbf16>, vector<1x16x16x12xbf16>, vector<1x16x1x12xbf16> -> vector<1x16x18x12xbf16>
    %17 = vector.extract_strided_slice %16 {offsets = [0, 0, 0, 0], sizes = [1, 16, 16, 12], strides = [1, 1, 1, 1]} : vector<1x16x18x12xbf16> to vector<1x16x16x12xbf16>
    %18 = vector.extract_strided_slice %16 {offsets = [0, 0, 1, 0], sizes = [1, 16, 16, 12], strides = [1, 1, 1, 1]} : vector<1x16x18x12xbf16> to vector<1x16x16x12xbf16>
    %19 = vector.extract_strided_slice %16 {offsets = [0, 0, 2, 0], sizes = [1, 16, 16, 12], strides = [1, 1, 1, 1]} : vector<1x16x18x12xbf16> to vector<1x16x16x12xbf16>
    %20 = tpu.concatenate %17, %18, %19 in 3 : vector<1x16x16x12xbf16>, vector<1x16x16x12xbf16>, vector<1x16x16x12xbf16> -> vector<1x16x16x36xbf16>
    %cst_7 = arith.constant 0.000000e+00 : bf16
    %21 = vector.broadcast %cst_7 : bf16 to vector<1x1x16x36xbf16>
    %22 = tpu.concatenate %21, %20, %21 in 1 : vector<1x1x16x36xbf16>, vector<1x16x16x36xbf16>, vector<1x1x16x36xbf16> -> vector<1x18x16x36xbf16>
    %23 = vector.extract_strided_slice %22 {offsets = [0, 0, 0, 0], sizes = [1, 16, 16, 36], strides = [1, 1, 1, 1]} : vector<1x18x16x36xbf16> to vector<1x16x16x36xbf16>
    %24 = vector.extract_strided_slice %22 {offsets = [0, 1, 0, 0], sizes = [1, 16, 16, 36], strides = [1, 1, 1, 1]} : vector<1x18x16x36xbf16> to vector<1x16x16x36xbf16>
    %25 = vector.extract_strided_slice %22 {offsets = [0, 2, 0, 0], sizes = [1, 16, 16, 36], strides = [1, 1, 1, 1]} : vector<1x18x16x36xbf16> to vector<1x16x16x36xbf16>
    %cst_8 = arith.constant 0.000000e+00 : bf16
    %26 = vector.broadcast %cst_8 : bf16 to vector<1x16x16x20xbf16>
    %27 = tpu.concatenate %23, %24, %25, %26 in 3 : vector<1x16x16x36xbf16>, vector<1x16x16x36xbf16>, vector<1x16x16x36xbf16>, vector<1x16x16x20xbf16> -> vector<1x16x16x128xbf16>
    %28 = vector.shape_cast %27 : vector<1x16x16x128xbf16> to vector<256x128xbf16>
    %c0_9 = arith.constant 0 : index
    %c0_10 = arith.constant 0 : index
    %29 = vector.load %arg2[%c0_9, %c0_10] : memref<128x256xbf16, #tpu.memory_space<vmem>>, vector<128x256xbf16>
    %cst_11 = arith.constant dense<0.000000e+00> : vector<256x256xf32>
    %30 = tpu.matmul %28, %29, %cst_11 {dimension_numbers = #tpu.dot_dimension_numbers<[1], [0], [0], [1], [0, 0, 1, 1], [], []>} : vector<256x128xbf16>, vector<128x256xbf16>, vector<256x256xf32> -> vector<256x256xf32>
    %c0_12 = arith.constant 0 : index
    %c0_13 = arith.constant 0 : index
    %31 = vector.load %arg3[%c0_12, %c0_13] : memref<1x256xf32, #tpu.memory_space<vmem>>, vector<1x256xf32>
    %32 = vector.broadcast %31 : vector<1x256xf32> to vector<256x256xf32>
    %33 = arith.addf %30, %32 : vector<256x256xf32>
    %34 = vector.shape_cast %33 : vector<256x256xf32> to vector<1x16x16x256xf32>
    %c0_14 = arith.constant 0 : index
    %c0_15 = arith.constant 0 : index
    %c0_16 = arith.constant 0 : index
    %c0_17 = arith.constant 0 : index
    %35 = vector.load %arg4[%c0_14, %c0_15, %c0_16, %c0_17] : memref<1x16x16x256xf32, #tpu.memory_space<vmem>>, vector<1x16x16x256xf32>
    tpu.vector_store %arg4[%c0_14, %c0_15, %c0_16, %c0_17], %34 {strides = array<i32>} : memref<1x16x16x256xf32, #tpu.memory_space<vmem>>, vector<1x16x16x256xf32>,
    return
  }
  func.func @transform_0(%arg0: i32) -> (i32, i32, i32, i32) {
    %c0_i32 = arith.constant 0 : i32
    %c0_i32_0 = arith.constant 0 : i32
    %c0_i32_1 = arith.constant 0 : i32
    %c0_i32_2 = arith.constant 0 : i32
    return %arg0, %c0_i32, %c0_i32_0, %c0_i32_1 : i32, i32, i32, i32
  }
  func.func @transform_1(%arg0: i32) -> (i32, i32) {
    %c0_i32 = arith.constant 0 : i32
    %c0_i32_0 = arith.constant 0 : i32
    %c0_i32_1 = arith.constant 0 : i32
    return %c0_i32, %c0_i32_0 : i32, i32
  }
  func.func @transform_2(%arg0: i32) -> (i32, i32) {
    %c0_i32 = arith.constant 0 : i32
    %c0_i32_0 = arith.constant 0 : i32
    %c0_i32_1 = arith.constant 0 : i32
    return %c0_i32, %c0_i32_0 : i32, i32
  }
  func.func @transform_3(%arg0: i32) -> (i32, i32, i32, i32) {
    %c0_i32 = arith.constant 0 : i32
    %c0_i32_0 = arith.constant 0 : i32
    %c0_i32_1 = arith.constant 0 : i32
    %c0_i32_2 = arith.constant 0 : i32
    return %arg0, %c0_i32, %c0_i32_0, %c0_i32_1 : i32, i32, i32, i32
  }
}

</mosaic_0001>

<bundles_post_ra>
// kernel: tpu_custom_call.1
= control target key start
LH: loop header
LB: loop body
LE: loop exit
PB: predicated region body
PF: predicated region fallthrough
CT: control target
= control target key end

     0   :  { %8 = vsyncpa [#allocation3], 0  ;;  %s3234_s0 = inlined_call_operand.vmem [shape: f32[2,16,16,4], index: 0, kind: input, shape index: {}]   ;;  %s3235_s1 = inlined_call_operand.vmem [shape: bf16[128,256], index: 1, kind: input, shape index: {}]   ;;  %s3236_s2 = inlined_call_operand.vmem [shape: f32[1,256], index: 2, kind: input, shape index: {}]   ;;  %s3237_s3 = inlined_call_operand.hbm [shape: f32[2,16,16,256], index: 3, kind: output, shape index: {}]  }
   0x1   :  { %10 = vsyncpa [#allocation3 + $0x1], 0  ;;  %s2025_s12 = smov 0   ;;  %s2027_s13 = smov 0  }
   0x2   :  { %s2029_s14 = smov 0   ;;  %s2031_s15 = smov 0  }
   0x3 LB: > { %s2046_s16 = sadd.s32 4294967295, %s1993_s15   ;;  %s1754_s17 = sadd.s32 4294967294, %s1993_s15   ;;  %s1993_s15 = sphi %s2031_s15, %s3281_s15   ;;  %s1989_s14 = sphi %s2029_s14, %s3280_s14   ;;  %s1985_s13 = sphi %s2027_s13, %s3279_s13   ;;  %s1981_s12 = sphi %s2025_s12, %s3278_s12  }
   0x4   : > { %s2050_s18 = sadd.s32 1, %s1993_s15   ;;  %s91_s19 = sadd.s32 1, %s1989_s14 }
   0x5   : > { %s88_s20 = ssub.s32 %s1993_s15, %s2050_s18  ;;  %p101_p0 = scmp.ne.s32.totalorder %s1989_s14, %s1985_s13 }
   0x6   : > { %p89_p1 = scmp.eq.s32.totalorder %s88_s20, 0  ;;  %p102_p2 = scmp.eq.s32.totalorder %s2046_s16, 1 }
   0x7   : > { %p107_p3 = scmp.ne.s32.totalorder %s1985_s13, %s1981_s12  ;;  %p108_p4 = scmp.eq.s32.totalorder %s1754_s17, 1 }
   0x8   : > { %s2061_s21 = scalar_select %p89_p1, %s1989_s14, %s91_s19  }
   0x9   : > { %p2063_p5 = por %p102_p2, %p101_p0  ;;  %p2067_p6 = por %p108_p4, %p107_p3 }
   0xa   : > { %p1757_p7 = scmp.ge.s32.totalorder %s1993_s15, 1  ;;  %p140_p8 = scmp.lt.s32.totalorder %s1993_s15, 3 }
   0xc   : > { %p141_p9 = pnand %p1757_p7, %p140_p8 }
   0xe   : > { %144 = sbr.rel (%p141_p9) target bundleno = 739 (0x2e3), region = 32 }
  0x13   : > { %p164_p10 = scmp.lt.s32.totalorder %s2046_s16, 1  ;;  %vm202_vm0 = vcmask 31744   ;;  %s1995_s29 = smov 8   ;;  %vm500_vm1 = vcmask 64512   ;;  %vm693_vm2 = vcmask 1040384   ;;  %vm985_vm5 = vcmask 1046528  }
  0x14   : > { %s1996_s30 = smov 4   ;;  %vm694_vm3 = vsmask.f32 256  ;;  %vm728_vm6 = vsmask.f32 7424  ;;  %s1997_s4 = smov 24  }
  0x15   : > { %s165_s24 = scalar_select %p164_p10, %s2046_s16, 1  ;;  %vm2429_vm4 = vmand %vm693_vm2, %vm694_vm3  ;;  %vm1066_vm7 = vcmask 97280   ;;  %vm1099_vm8 = vcmask 195584   ;;  %vm1213_vm9 = vcmask 293888   ;;  %vm1247_vm10 = vcmask 588800  }
  0x16   : > { %s1998_s5 = smov 12   ;;  %vm1280_vm11 = vcmask 883712   ;;  %s1799_s9 = sshll.u32 %s2046_s16, 13 }
  0x17   : > { %s1798_s25 = sshll.u32 %s165_s24, 8  ;;  %s3184_s19 = scalar_lea.hbm %s3237_s3, %s1799_s9 }
  0x18   : > { %s2078_s28 = scalar_lea.vmem %s3234_s0, %s1798_s25  ;;  %s2002_s24 = smov [#allocation2]  }
  0x19   : > { %v2081_v0 = vld [vmem:[%s2078_s28 + $0x10] sm:$0xff]  ;;  %v2084_v1 = vld [vmem:[%s2078_s28 + $0x18] sm:$0xff]  ;;  %v2087_v2 = vld [vmem:[%s2078_s28 + $0x20] sm:$0xff]  ;;  %s1937_s25 = sshll.u32 %s2002_s24, 4  ;;  %s1938_s25 = int_to_ptr.vmem [resolvable:$false] %s1937_s25 }
  0x1a   : > { %3252 = vst [vmem:[#allocation5_spill] sm:$0xff] %v2081_v0  ;;  %3253 = vst [vmem:[#allocation6_spill] sm:$0xff] %v2084_v1  ;;  %v2090_v3 = vld [vmem:[%s2078_s28 + $0x28] sm:$0xff]  ;;  %v2093_v4 = vld [vmem:[%s2078_s28 + $0x30] sm:$0xff]  ;;  %v204_v6 = vsel %vm202_vm0, %v2081_v0, 0.0  ;;  %v206_v7 = vsel %vm202_vm0, %v2087_v2, 0.0 }
  0x1b   : > { %3254 = vst [vmem:[#allocation7_spill] sm:$0xff] %v2087_v2  ;;  %3255 = vst [vmem:[#allocation8_spill] sm:$0xff] %v2090_v3  ;;  %v2096_v5 = vld [vmem:[%s2078_s28 + $0x38] sm:$0xff]  ;;  %v235_v8 = vsel %vm202_vm0, %v2084_v1, 0.0  ;;  %v2105_v9 = vld [vmem:[%s2078_s28 + $0x40] sm:$0xff]  ;;  %v2115_v12 = vsel %vm202_vm0, %v2093_v4, 0.0 }
  0x1c   : > { %3256 = vst [vmem:[#allocation9_spill] sm:$0xff] %v2105_v9  ;;  %v2108_v10 = vld [vmem:[%s2078_s28 + $0x48] sm:$0xff]  ;;  %v2111_v11 = vld [vmem:[%s2078_s28 + $0x50] sm:$0xff]  ;;  %v237_v13 = vsel %vm202_vm0, %v2090_v3, 0.0  ;;  %v2121_v14 = vsel %vm202_vm0, %v2096_v5, 0.0  ;;  %v275_v15 = vadd.f32 %v235_v8, %v204_v6  ;;  %v2124_v16 = vld [vmem:[%s2078_s28 + $0x58] sm:$0xff] }
  0x1d   : > { %3257 = vst [vmem:[#allocation10_spill] sm:$0xff] %v2108_v10  ;;  %v2127_v17 = vld [vmem:[%s2078_s28 + $0x60] sm:$0xff]  ;;  %v2130_v18 = vld [vmem:[%s2078_s28 + $0x68] sm:$0xff]  ;;  %v210_v19 = vsel %vm202_vm0, %v2105_v9, 0.0  ;;  %v2136_v20 = vsel %vm202_vm0, %v2111_v11, 0.0  ;;  %v241_v21 = vsel %vm202_vm0, %v2108_v10, 0.0  ;;  %v282_v22 = vadd.f32 %v237_v13, %v206_v7 }
  0x1e   : > { %v2141_v23 = vld [vmem:[%s2078_s28 + $0x70] sm:$0xff]  ;;  %v2144_v24 = vld [vmem:[%s2078_s28 + $0x78] sm:$0xff]  ;;  %v2147_v25 = vld [vmem:[%s2078_s28 + $0x80] sm:$0xff]  ;;  %v2151_v26 = vsel %vm202_vm0, %v2127_v17, 0.0  ;;  %v2155_v27 = vsel %vm202_vm0, %v2124_v16, 0.0  ;;  %v2159_v28 = vsel %vm202_vm0, %v2130_v18, 0.0  ;;  %v296_v29 = vadd.f32 %v241_v21, %v210_v19 }
  0x1f   : > { %v2162_v30 = vld [vmem:[%s2078_s28 + $0x88] sm:$0xff]  ;;  %v2165_v31 = vld [vmem:[%s2078_s28 + $0x90] sm:$0xff]  ;;  %v2168_v32 = vld [vmem:[%s2078_s28 + $0x98] sm:$0xff]  ;;  %v2172_v33 = vsel %vm202_vm0, %v2141_v23, 0.0  ;;  %v2176_v34 = vsel %vm202_vm0, %v2147_v25, 0.0  ;;  %v2180_v35 = vsel %vm202_vm0, %v2144_v24, 0.0  ;;  %v2184_v36 = vadd.f32 %v2159_v28, %v2151_v26 }
  0x20   : > { %3258 = vst [vmem:[#allocation11_spill] sm:$0xff] %v2165_v31  ;;  %3259 = vst [vmem:[#allocation12_spill] sm:$0xff] %v2168_v32  ;;  %v2188_v37 = vsel %vm202_vm0, %v2165_v31, 0.0  ;;  %v2192_v38 = vsel %vm202_vm0, %v2162_v30, 0.0  ;;  %v2196_v39 = vsel %vm202_vm0, %v2168_v32, 0.0  ;;  %v276_v40 = vrot.slane %v275_v15, 4 }
  0x21   : > { %v2199_v41 = vld [vmem:[%s2078_s28] sm:$0xff]  ;;  %v2202_v42 = vld [vmem:[%s2078_s28 + $0x8] sm:$0xff]  ;;  %v331_v43 = vadd.f32 %v2196_v39, %v2188_v37  ;;  %v283_v48 = vrot.slane %v282_v22, 4  ;;  %s1939_s26 = scalar_lea.vmem %s1938_s25, 16384 }
  0x22   : > { %v2208_v44 = vsel %vm202_vm0, %v2199_v41, 0.0  ;;  %v2212_v45 = vsel %vm202_vm0, %v2202_v42, 0.0  ;;  %v2215_v46 = vld [vmem:[%s2078_s28 + $0xa0] sm:$0xff]  ;;  %v2218_v47 = vld [vmem:[%s2078_s28 + $0xa8] sm:$0xff]  ;;  %v277_v50 = vadd.f32 %v276_v40, %v275_v15  ;;  %v297_v15 = vrot.slane %v296_v29, 4 }
  0x23   : > { %3260 = vst [vmem:[#allocation13_spill] sm:$0xff] %v2215_v46  ;;  %3261 = vst [vmem:[#allocation14_spill] sm:$0xff] %v2218_v47  ;;  %v2221_v49 = vld [vmem:[%s2078_s28 + $0xc0] sm:$0xff]  ;;  %v205_v51 = vadd.f32 %v204_v6, %v2208_v44  ;;  %v236_v52 = vadd.f32 %v235_v8, %v2212_v45  ;;  %v2227_v53 = vsel %vm202_vm0, %v2215_v46, 0.0  ;;  %v2230_v54 = vld [vmem:[%s2078_s28 + $0xc8] sm:$0xff]  ;;  %v332_v55 = vrot.slane %v331_v43, 4 }
  0x24   : > { %3262 = vst [vmem:[#allocation15_spill] sm:$0xff] %v2221_v49  ;;  %3263 = vst [vmem:[#allocation16_spill] sm:$0xff] %v2230_v54  ;;  %v2234_v56 = vsel %vm202_vm0, %v2218_v47, 0.0  ;;  %v284_v57 = vadd.f32 %v283_v48, %v282_v22  ;;  %v2238_v58 = vsel %vm202_vm0, %v2221_v49, 0.0  ;;  %v278_v59 = vrot.slane %v277_v50, 2 }
  0x25   : > { %v207_v60 = vadd.f32 %v206_v7, %v205_v51  ;;  %v238_v61 = vadd.f32 %v237_v13, %v236_v52  ;;  %v338_v62 = vadd.f32 %v2234_v56, %v2227_v53  ;;  %v333_v63 = vadd.f32 %v332_v55, %v331_v43 }
  0x26   : > { %v285_v6 = vrot.slane %v284_v57, 2  ;;  %v2244_v8 = vsel %vm202_vm0, %v2230_v54, 0.0  ;;  %v279_v40 = vadd.f32 %v278_v59, %v277_v50  ;;  %v298_v7 = vadd.f32 %v297_v15, %v296_v29 }
  0x27   : > { %v209_v22 = vadd.f32 %v2115_v12, %v207_v60  ;;  %v240_v48 = vadd.f32 %v2121_v14, %v238_v61  ;;  %v339_v10 = vrot.slane %v338_v62, 4  ;;  %v334_v9 = vrot.slane %v333_v63, 2 }
  0x28   : > { %v286_v49 = vadd.f32 %v285_v6, %v284_v57  ;;  %v352_v13 = vadd.f32 %v2244_v8, %v2238_v58  ;;  %v280_v51 = vrot.slane %v279_v40, 1  ;;  %v299_v50 = vrot.slane %v298_v7, 2 }
  0x29   : > { %v211_v43 = vadd.f32 %v210_v19, %v209_v22  ;;  %v242_v52 = vadd.f32 %v241_v21, %v240_v48  ;;  %v340_v55 = vadd.f32 %v339_v10, %v338_v62  ;;  %v335_v54 = vadd.f32 %v334_v9, %v333_v63  ;;  %v2253_v19 = vld [vmem:[%s2078_s28 + $0xb0] sm:$0xff] }
  0x2a   : > { %v287_v3 = vrot.slane %v286_v49, 1  ;;  %v353_v59 = vrot.slane %v352_v13, 4  ;;  %v281_v60 = vadd.f32 %v280_v51, %v279_v40  ;;  %v300_v15 = vadd.f32 %v299_v50, %v298_v7  ;;  %v2258_v63 = vld [vmem:[%s2078_s28 + $0xd0] sm:$0xff] }
  0x2b   : > { %v213_v61 = vadd.f32 %v2136_v20, %v211_v43  ;;  %v244_v2 = vadd.f32 %v2155_v27, %v242_v52  ;;  %v341_v29 = vrot.slane %v340_v55, 2  ;;  %v336_v57 = vrot.slane %v335_v54, 1  ;;  %v2273_v52 = vld [vmem:[%s2078_s28 + $0xb8] sm:$0xff] }
  0x2c   : > { %v288_v6 = vadd.f32 %v287_v3, %v286_v49  ;;  %v354_v47 = vadd.f32 %v353_v59, %v352_v13  ;;  %v381_v10 = vmul.f32 0.0625, %v281_v60  ;;  %v301_v48 = vrot.slane %v300_v15, 1  ;;  %v2261_v3 = vld [vmem:[%s2078_s28 + $0xe0] sm:$0xff]  ;;  %v2266_v13 = vld [vmem:[%s2078_s28 + $0xf0] sm:$0xff] }
  0x2d   : > { %v215_v9 = vadd.f32 %v2151_v26, %v213_v61  ;;  %v246_v21 = vadd.f32 %v2159_v28, %v244_v2  ;;  %v342_v62 = vadd.f32 %v341_v29, %v340_v55  ;;  %v337_v40 = vadd.f32 %v336_v57, %v335_v54  ;;  %v2280_v61 = vld [vmem:[%s2078_s28 + $0xd8] sm:$0xff]  ;;  %v2283_v29 = vld [vmem:[%s2078_s28 + $0xe8] sm:$0xff] }
  0x2e   : > { %v382_v22 = vmul.f32 0.0625, %v288_v6  ;;  %v355_v51 = vrot.slane %v354_v47, 2  ;;  %v2270_v2 = vsel %vm202_vm0, %v2253_v19, 0.0  ;;  %v302_v54 = vadd.f32 %v301_v48, %v300_v15  ;;  %v2286_v57 = vld [vmem:[%s2078_s28 + $0xf8] sm:$0xff] }
  0x2f   : > { %v217_v49 = vadd.f32 %v2172_v33, %v215_v9  ;;  %v248_v7 = vadd.f32 %v2180_v35, %v246_v21  ;;  %v343_v26 = vrot.slane %v342_v62, 1  ;;  %v389_v28 = vmul.f32 0.0625, %v337_v40 }
  0x30   : > { %v356_v43 = vadd.f32 %v355_v51, %v354_v47  ;;  %v228_v55 = vsel %vm202_vm0, %v2258_v63, 0.0  ;;  %v230_v6 = vsel %vm202_vm0, %v2261_v3, 0.0  ;;  %v384_v9 = vmul.f32 0.0625, %v302_v54 }
  0x31   : > { %v219_v50 = vadd.f32 %v2176_v34, %v217_v49  ;;  %v250_v59 = vadd.f32 %v2192_v38, %v248_v7  ;;  %v344_v60 = vadd.f32 %v343_v26, %v342_v62  ;;  %v1874_v47 = vpack.i.bf16 %v389_v28, %v381_v10 }
  0x32   : > { %v357_v15 = vrot.slane %v356_v43, 1  ;;  %v232_v21 = vsel %vm202_vm0, %v2266_v13, 0.0  ;;  %v255_v51 = vsel %vm202_vm0, %v2273_v52, 0.0  ;;  %v259_v10 = vsel %vm202_vm0, %v2280_v61, 0.0 }
  0x33   : > { %v221_v40 = vadd.f32 %v2188_v37, %v219_v50  ;;  %v252_v48 = vadd.f32 %v2196_v39, %v250_v59  ;;  %v390_v62 = vmul.f32 0.0625, %v344_v60  ;;  %1875 = vrot.lane.b32.xlu1 %v1874_v47, %s1995_s29  ;;  %v261_v7 = vsel %vm202_vm0, %v2283_v29, 0.0 }
  0x34   : > { %v358_v49 = vadd.f32 %v357_v15, %v356_v43  ;;  %v263_v26 = vsel %vm202_vm0, %v2286_v57, 0.0  ;;  %v359_v54 = vadd.f32 %v259_v10, %v228_v55  ;;  %v366_v59 = vadd.f32 %v261_v7, %v230_v6 }
  0x35   : > { %v1879_v37 = vpack.i.bf16 %v390_v62, %v382_v22  ;;  %v223_v39 = vadd.f32 %v2227_v53, %v221_v40  ;;  %v254_v28 = vadd.f32 %v2234_v56, %v252_v48  ;;  %v373_v60 = vadd.f32 %v263_v26, %v232_v21 }
  0x36   : > { %v392_v50 = vmul.f32 0.0625, %v358_v49  ;;  %v311_v43 = vrot.slane %v2184_v36, 4  ;;  %v360_v46 = vrot.slane %v359_v54, 4  ;;  %v268_v1 = vadd.f32 %v2212_v45, %v2208_v44 }
  0x37   : > { %v225_v47 = vadd.f32 %v2270_v2, %v223_v39  ;;  %v256_v15 = vadd.f32 %v255_v51, %v254_v28  ;;  %1880 = vrot.lane.b32.xlu1 %v1879_v37, %s1995_s29  ;;  %v367_v62 = vrot.slane %v366_v59, 4  ;;  %v374_v53 = vrot.slane %v373_v60, 4 }
  0x38   : > { %v1889_v22 = vpack.i.bf16 %v392_v50, %v384_v9  ;;  %v312_v56 = vadd.f32 %v311_v43, %v2184_v36  ;;  %v269_v49 = vrot.slane %v268_v1, 4  ;;  %v324_v39 = vadd.f32 %v2192_v38, %v2176_v34 }
  0x39   : > { %v227_v40 = vadd.f32 %v2238_v58, %v225_v47  ;;  %v258_v48 = vadd.f32 %v2244_v8, %v256_v15  ;;  %v368_v28 = vadd.f32 %v367_v62, %v366_v59  ;;  %v375_v0 = vadd.f32 %v374_v53, %v373_v60 }
  0x3a   : > { %v313_v32 = vrot.slane %v312_v56, 2  ;;  %v289_v44 = vadd.f32 %v2121_v14, %v2115_v12  ;;  %v270_v37 = vadd.f32 %v269_v49, %v268_v1  ;;  %v325_v50 = vrot.slane %v324_v39, 4 }
  0x3b   : > { %v229_v45 = vadd.f32 %v228_v55, %v227_v40  ;;  %v260_v9 = vadd.f32 %v259_v10, %v258_v48  ;;  %1890 = vrot.lane.b32.xlu1 %v1889_v22, %s1995_s29  ;;  %v376_v36 = vrot.slane %v375_v0, 2  ;;  %v369_v43 = vrot.slane %v368_v28, 2 }
  0x3c   : > { %v314_v58 = vadd.f32 %v313_v32, %v312_v56  ;;  %v290_v8 = vrot.slane %v289_v44, 4  ;;  %v271_v31 = vrot.slane %v270_v37, 2  ;;  %v326_v34 = vadd.f32 %v325_v50, %v324_v39 }
  0x3d   : > { %v231_v47 = vadd.f32 %v230_v6, %v229_v45  ;;  %v262_v15 = vadd.f32 %v261_v7, %v260_v9  ;;  %v370_v59 = vadd.f32 %v369_v43, %v368_v28  ;;  %v345_v62 = vadd.f32 %v255_v51, %v2270_v2 }
  0x3e   : > { %v315_v38 = vrot.slane %v314_v58, 1  ;;  %v291_v60 = vadd.f32 %v290_v8, %v289_v44  ;;  %v272_v55 = vadd.f32 %v271_v31, %v270_v37  ;;  %v327_v1 = vrot.slane %v326_v34, 2 }
  0x3f   : > { %v233_v12 = vadd.f32 %v232_v21, %v231_v47  ;;  %v264_v14 = vadd.f32 %v263_v26, %v262_v15  ;;  %v371_v53 = vrot.slane %v370_v59, 1  ;;  %v346_v40 = vrot.slane %v345_v62, 4 }
  0x40   : > { %v316_v10 = vadd.f32 %v315_v38, %v314_v58  ;;  %v292_v22 = vrot.slane %v291_v60, 2  ;;  %v273_v48 = vrot.slane %v272_v55, 1  ;;  %v328_v6 = vadd.f32 %v327_v1, %v326_v34 }
  0x41   : > { %v266_v32 = vmul.f32 0.0625, %v233_v12  ;;  %v267_v56 = vmul.f32 0.0625, %v264_v14  ;;  %v372_v7 = vadd.f32 %v371_v53, %v370_v59  ;;  %v347_v45 = vadd.f32 %v346_v40, %v345_v62 }
  0x42   : > { %v386_v49 = vmul.f32 0.0625, %v316_v10  ;;  %v293_v39 = vadd.f32 %v292_v22, %v291_v60  ;;  %v274_v44 = vadd.f32 %v273_v48, %v272_v55  ;;  %v329_v9 = vrot.slane %v328_v6, 1 }
  0x43   : > { %v1864_v28 = vpack.i.bf16 %v267_v56, %v266_v32  ;;  %v303_v2 = vadd.f32 %v2155_v27, %v2136_v20  ;;  %v394_v31 = vmul.f32 0.0625, %v372_v7  ;;  %v348_v51 = vrot.slane %v347_v45, 2 }
  0x44   : > { %v294_v21 = vrot.slane %v293_v39, 1  ;;  %v361_v26 = vadd.f32 %v360_v46, %v359_v54  ;;  %v330_v37 = vadd.f32 %v329_v9, %v328_v6  ;;  %v380_v50 = vmul.f32 0.0625, %v274_v44 }
  0x45   : > { %1865 = vrot.lane.b32.xlu0 %v1864_v28, %s1996_s30  ;;  %v304_v58 = vrot.slane %v303_v2, 4  ;;  %v317_v43 = vadd.f32 %v2180_v35, %v2172_v33  ;;  %v1899_v8 = vpack.i.bf16 %v394_v31, %v386_v49  ;;  %v349_v15 = vadd.f32 %v348_v51, %v347_v45  ;;  %s2001_s30 = smov 72  }
  0x46   : > { %v295_v47 = vadd.f32 %v294_v21, %v293_v39  ;;  %v362_v34 = vrot.slane %v361_v26, 2  ;;  %v388_v38 = vmul.f32 0.0625, %v330_v37  ;;  %v377_v20 = vadd.f32 %v376_v36, %v375_v0 }
  0x47   : > { %v305_v59 = vadd.f32 %v304_v58, %v303_v2  ;;  %v318_v60 = vrot.slane %v317_v43, 4  ;;  %1900 = vrot.lane.b32.xlu1 %v1899_v8, %s1995_s29  ;;  %v350_v27 = vrot.slane %v349_v15, 1 }
  0x48   : > { %v363_v46 = vadd.f32 %v362_v34, %v361_v26  ;;  %v1869_v54 = vpack.i.bf16 %v388_v38, %v380_v50  ;;  %v378_v14 = vrot.slane %v377_v20, 1  ;;  %v383_v1 = vmul.f32 0.0625, %v295_v47 }
  0x49   : > { %v306_v62 = vrot.slane %v305_v59, 2  ;;  %v319_v12 = vadd.f32 %v318_v60, %v317_v43  ;;  %v351_v55 = vadd.f32 %v350_v27, %v349_v15 }
  0x4a   : > { %v364_v10 = vrot.slane %v363_v46, 1  ;;  %1870 = vrot.lane.b32.xlu0 %v1869_v54, %s1995_s29  ;;  %v379_v0 = vadd.f32 %v378_v14, %v377_v20 }
  0x4b   : > { %v307_v33 = vadd.f32 %v306_v62, %v305_v59  ;;  %v320_v35 = vrot.slane %v319_v12, 2  ;;  %v391_v53 = vmul.f32 0.0625, %v351_v55 }
  0x4c   : > { %v365_v22 = vadd.f32 %v364_v10, %v363_v46  ;;  %v395_v39 = vmul.f32 0.0625, %v379_v0 }
  0x4d   : > { %v308_v40 = vrot.slane %v307_v33, 1  ;;  %v321_v32 = vadd.f32 %v320_v35, %v319_v12  ;;  %v1884_v36 = vpack.i.bf16 %v391_v53, %v383_v1 }
  0x4e   : > { %v393_v48 = vmul.f32 0.0625, %v365_v22 }
  0x4f   : > { %v309_v56 = vadd.f32 %v308_v40, %v307_v33  ;;  %v322_v6 = vrot.slane %v321_v32, 1  ;;  %1885 = vrot.lane.b32.xlu0 %v1884_v36, %s1995_s29 }
  0x51   : > { %v385_v7 = vmul.f32 0.0625, %v309_v56  ;;  %v323_v49 = vadd.f32 %v322_v6, %v321_v32 }
  0x53   : > { %v1894_v45 = vpack.i.bf16 %v393_v48, %v385_v7  ;;  %v387_v28 = vmul.f32 0.0625, %v323_v49 }
  0x55   : > { %1895 = vrot.lane.b32.xlu0 %v1894_v45, %s1995_s29  ;;  %v1904_v44 = vpack.i.bf16 %v395_v39, %v387_v28 }
  0x59   : > { %1905 = vrot.lane.b32.xlu0 %v1904_v44, %s1995_s29  ;;  %s2000_s29 = smov 36  }
  0xa5   : > { %v2328_v9 = vpop.permute.xlu1 %1875 }
  0xa6   : > { %v1878_v50 = vunpack.i.h.bf16 %v2328_v9  ;;  %v1877_v43 = vunpack.i.l.bf16 %v2328_v9  ;;  %v3271_v9 = vld [vmem:[#allocation14_spill] sm:$0xff] }
  0xa9   : > { %v2330_v2 = vpop.permute.xlu1 %1880 }
  0xaa   : > { %v1883_v8 = vunpack.i.h.bf16 %v2330_v2  ;;  %v1882_v38 = vunpack.i.l.bf16 %v2330_v2 }
  0xad   : > { %v2332_v31 = vpop.permute.xlu1 %1890 }
  0xae   : > { %v1892_v53 = vunpack.i.l.bf16 %v2332_v31 }
  0xb7   : > { %v1866_v21 = vpop.permute.xlu0 %1865 }
  0xb8   : > { %v2334_v51 = vunpack.i.h.bf16 %v1866_v21  ;;  %v2336_v26 = vunpack.i.l.bf16 %v1866_v21 }
  0xb9   : > { %v1901_v37 = vpop.permute.xlu1 %1900 }
  0xba   : > { %v1902_v58 = vunpack.i.l.bf16 %v1901_v37  ;;  %v480_v47 = vsel %vm202_vm0, %v2127_v17, %v2336_v26  ;;  %v481_v15 = vsel %vm202_vm0, %v2130_v18, %v2334_v51  ;;  %v1903_v59 = vunpack.i.h.bf16 %v1901_v37 }
  0xbb   : > { %v496_v27 = vsel %vm202_vm0, %v2261_v3, %v2336_v26  ;;  %v497_v46 = vsel %vm202_vm0, %v2283_v29, %v2334_v51  ;;  %v468_v17 = vsel %vm202_vm0, %v2199_v41, %v2336_v26  ;;  %v469_v18 = vsel %vm202_vm0, %v2202_v42, %v2334_v51 }
  0xbc   : > { %v1871_v34 = vpop.permute.xlu0 %1870  ;;  %v513_v54 = vsel %vm500_vm1, %v480_v47, %v1902_v58  ;;  %v514_v62 = vsel %vm500_vm1, %v481_v15, %v1902_v58  ;;  %v484_v3 = vsel %vm202_vm0, %v2147_v25, %v2336_v26  ;;  %v485_v29 = vsel %vm202_vm0, %v2162_v30, %v2334_v51 }
  0xbd   : > { %v1873_v60 = vunpack.i.h.bf16 %v1871_v34  ;;  %v1872_v20 = vunpack.i.l.bf16 %v1871_v34  ;;  %v529_v55 = vsel %vm500_vm1, %v496_v27, %v1903_v59  ;;  %v530_v1 = vsel %vm500_vm1, %v497_v46, %v1903_v59 }
  0xbe   : > { %v1893_v25 = vunpack.i.h.bf16 %v2332_v31  ;;  %v2376_v30 = vpack.c.bf16 %v514_v62, %v513_v54  ;;  %v474_v36 = vsel %vm202_vm0, %v2093_v4, %v2336_v26  ;;  %v2381_v56 = vpack.c.bf16 %v530_v1, %v529_v55  ;;  %v3266_v62 = vld [vmem:[#allocation11_spill] sm:$0xff] }
  0xbf   : > { %v501_v41 = vsel %vm500_vm1, %v468_v17, %v1872_v20  ;;  %v502_v12 = vsel %vm500_vm1, %v469_v18, %v1872_v20  ;;  %v517_v42 = vsel %vm500_vm1, %v484_v3, %v1873_v60  ;;  %v518_v14 = vsel %vm500_vm1, %v485_v29, %v1873_v60  ;;  %v3267_v29 = vld [vmem:[#allocation12_spill] sm:$0xff] }
  0xc0   : > { %v533_v10 = vpack.c.bf16 %v502_v12, %v501_v41  ;;  %v541_v33 = vpack.c.bf16 %v518_v14, %v517_v42  ;;  %v475_v48 = vsel %vm202_vm0, %v2096_v5, %v2334_v51  ;;  %v490_v6 = vsel %vm202_vm0, %v2253_v19, %v2336_v26 }
  0xc1   : > { %v1886_v35 = vpop.permute.xlu0 %1885  ;;  %v491_v7 = vsel %vm202_vm0, %v2273_v52, %v2334_v51  ;;  %v478_v4 = vsel %vm202_vm0, %v2111_v11, %v2336_v26  ;;  %v2400_v5 = vsel %vm202_vm0, %v2124_v16, %v2334_v51  ;;  %v592_v45 = vshrl.u32 %v2376_v30, 16 }
  0xc2   : > { %v1887_v22 = vunpack.i.l.bf16 %v1886_v35  ;;  %v550_v40 = vshrl.u32 %v533_v10, 16  ;;  %v606_v32 = vshrl.u32 %v541_v33, 16  ;;  %v1888_v0 = vunpack.i.h.bf16 %v1886_v35 }
  0xc3   : > { %v609_v19 = vshll.u32 %v541_v33, 16  ;;  %v595_v21 = vshll.u32 %v2376_v30, 16  ;;  %v553_v37 = vshll.u32 %v533_v10, 16  ;;  %v648_v11 = vshrl.u32 %v2381_v56, 16 }
  0xc4   : > { %v507_v49 = vsel %vm500_vm1, %v474_v36, %v1887_v22  ;;  %v508_v39 = vsel %vm500_vm1, %v475_v48, %v1887_v22  ;;  %v608_v44 = vrot.slane %v606_v32, 7  ;;  %v552_v52 = vrot.slane %v550_v40, 7 }
  0xc5   : > { %v523_v58 = vsel %vm500_vm1, %v490_v6, %v1888_v0  ;;  %v524_v47 = vsel %vm500_vm1, %v491_v7, %v1888_v0  ;;  %v2409_v15 = vpack.c.bf16 %v508_v39, %v507_v49  ;;  %v2414_v16 = vsel %vm202_vm0, %v2258_v63, %v2336_v26 }
  0xc6   : > { %v611_v34 = vor.u32 %v609_v19, %v608_v44  ;;  %v2419_v59 = vsel %vm202_vm0, %v2280_v61, %v2334_v51  ;;  %v482_v60 = vsel %vm202_vm0, %v2141_v23, %v2336_v26  ;;  %v483_v20 = vsel %vm202_vm0, %v2144_v24, %v2334_v51 }
  0xc7   : > { %v2403_v28 = vpop.permute.xlu0 %1895  ;;  %v555_v63 = vor.u32 %v553_v37, %v552_v52  ;;  %v2433_v46 = vpack.c.bf16 %v524_v47, %v523_v58  ;;  %v498_v17 = vsel %vm202_vm0, %v2266_v13, %v2336_v26  ;;  %v499_v23 = vsel %vm202_vm0, %v2286_v57, %v2334_v51 }
  0xc8   : > { %v720_v24 = vsel %vm2429_vm4, %v608_v44, 0  ;;  %v486_v3 = vsel %vm202_vm0, %v3266_v62, %v2336_v26  ;;  %v487_v41 = vsel %vm202_vm0, %v3267_v29, %v2334_v51  ;;  %v571_v12 = vshrl.u32 %v2409_v15, 16 }
  0xc9   : > { %v574_v13 = vshll.u32 %v2409_v15, 16  ;;  %v2453_v57 = vsel %vm2429_vm4, 0, %v611_v34  ;;  %v2457_v42 = vsel %vm2429_vm4, 0, %v555_v63  ;;  %v1898_v14 = vunpack.i.h.bf16 %v2403_v28 }
  0xca   : > { %v1897_v55 = vunpack.i.l.bf16 %v2403_v28  ;;  %v712_v1 = vsel %vm2429_vm4, %v552_v52, 0  ;;  %v833_v10 = vshll.u32 %v720_v24, 16  ;;  %v1010_v36 = vrot.slane %v2453_v57, 1 }
  0xcb   : > { %v1906_v61 = vpop.permute.xlu0 %1905  ;;  %v986_v48 = vrot.slane %v2457_v42, 1  ;;  %v1011_v6 = vrot.slane %v720_v24, 1  ;;  %v987_v7 = vrot.slane %v712_v1, 1  ;;  %v828_v49 = vshll.u32 %v2453_v57, 16 }
  0xcc   : > { %v1908_v18 = vunpack.i.h.bf16 %v1906_v61  ;;  %v1907_v54 = vunpack.i.l.bf16 %v1906_v61  ;;  %v732_v39 = vshll.u32 %v2457_v42, 16  ;;  %v511_v19 = vsel %vm500_vm1, %v478_v4, %v1897_v55  ;;  %v3268_v61 = vld [vmem:[#allocation5_spill] sm:$0xff] }
  0xcd   : > { %v826_v44 = vshrl.u32 %v2453_v57, 16  ;;  %v835_v52 = vrot.slane %v833_v10, 1  ;;  %v730_v37 = vshrl.u32 %v2457_v42, 16  ;;  %v1012_v58 = vsel %vm985_vm5, %v1010_v36, %v1011_v6 }
  0xce   : > { %v515_v33 = vsel %vm500_vm1, %v482_v60, %v1907_v54  ;;  %v516_v35 = vsel %vm500_vm1, %v483_v20, %v1907_v54  ;;  %v531_v22 = vsel %vm500_vm1, %v498_v17, %v1908_v18  ;;  %v532_v40 = vsel %vm500_vm1, %v499_v23, %v1908_v18  ;;  %1050 = vrot.lane.b32.xlu0 %v1012_v58, %s1997_s4  ;;  %v3269_v54 = vld [vmem:[#allocation6_spill] sm:$0xff] }
  0xcf   : > { %v2467_v32 = vpack.c.bf16 %v516_v35, %v515_v33  ;;  %v2469_v0 = vpack.c.bf16 %v532_v40, %v531_v22  ;;  %v988_v47 = vsel %vm985_vm5, %v986_v48, %v987_v7  ;;  %v830_v34 = vrot.slane %v828_v49, 1  ;;  %v3272_v48 = vld [vmem:[#allocation7_spill] sm:$0xff] }
  0xd0   : > { %v734_v60 = vrot.slane %v732_v39, 1  ;;  %1034 = vrot.lane.b32.xlu1 %v988_v47, %s1997_s4  ;;  %v737_v20 = vshll.u32 %v712_v1, 16  ;;  %v519_v4 = vsel %vm500_vm1, %v486_v3, %v1878_v50  ;;  %v520_v63 = vsel %vm500_vm1, %v487_v41, %v1878_v50  ;;  %v3270_v41 = vld [vmem:[#allocation13_spill] sm:$0xff] }
  0xd1   : > { %v470_v17 = vsel %vm202_vm0, %v3268_v61, %v2336_v26  ;;  %v831_v23 = vor.u32 %v830_v34, %v826_v44  ;;  %v542_v18 = vpack.c.bf16 %v520_v63, %v519_v4  ;;  %v471_v62 = vsel %vm202_vm0, %v3269_v54, %v2334_v51 }
  0xd2   : > { %v735_v24 = vor.u32 %v734_v60, %v730_v37  ;;  %v739_v29 = vrot.slane %v737_v20, 1  ;;  %v503_v3 = vsel %vm500_vm1, %v470_v17, %v1877_v43  ;;  %v504_v50 = vsel %vm500_vm1, %v471_v62, %v1877_v43 }
  0xd3   : > { %v488_v1 = vsel %vm202_vm0, %v3270_v41, %v2336_v26  ;;  %v512_v10 = vsel %vm500_vm1, %v2400_v5, %v1897_v55  ;;  %v836_v33 = vsel %vm728_vm6, %v831_v23, %v835_v52  ;;  %v613_v35 = vshrl.u32 %v542_v18, 16  ;;  %v3273_v52 = vld [vmem:[#allocation8_spill] sm:$0xff] }
  0xd4   : > { %v534_v22 = vpack.c.bf16 %v504_v50, %v503_v3  ;;  %937 = vrot.lane.b32.xlu0 %v836_v33, %s1998_s5  ;;  %v740_v40 = vsel %vm728_vm6, %v735_v24, %v739_v29  ;;  %v489_v43 = vsel %vm202_vm0, %v3271_v9, %v2334_v51  ;;  %v521_v36 = vsel %vm500_vm1, %v488_v1, %v1883_v8 }
  0xd5   : > { %v472_v5 = vsel %vm202_vm0, %v3272_v48, %v2336_v26  ;;  %921 = vrot.lane.b32.xlu1 %v740_v40, %s1998_s5  ;;  %v615_v55 = vrot.slane %v613_v35, 7  ;;  %v616_v6 = vshll.u32 %v542_v18, 16  ;;  %v522_v49 = vsel %vm500_vm1, %v489_v43, %v1883_v8 }
  0xd6   : > { %v557_v7 = vshrl.u32 %v534_v22, 16  ;;  %v560_v39 = vshll.u32 %v534_v22, 16  ;;  %v543_v44 = vpack.c.bf16 %v522_v49, %v521_v36  ;;  %v473_v37 = vsel %vm202_vm0, %v3273_v52, %v2334_v51 }
  0xd7   : > { %v505_v58 = vsel %vm500_vm1, %v472_v5, %v1882_v38  ;;  %v618_v47 = vor.u32 %v616_v6, %v615_v55  ;;  %v721_v34 = vsel %vm2429_vm4, %v615_v55, 0  ;;  %v506_v20 = vsel %vm500_vm1, %v473_v37, %v1882_v38 }
  0xd8   : > { %v559_v60 = vrot.slane %v557_v7, 7  ;;  %v627_v8 = vshrl.u32 %v2433_v46, 16  ;;  %v527_v4 = vsel %vm500_vm1, %v2414_v16, %v1898_v14  ;;  %v528_v63 = vsel %vm500_vm1, %v2419_v59, %v1898_v14 }
  0xd9   : > { %v620_v61 = vshrl.u32 %v543_v44, 16  ;;  %v2543_v17 = vsel %vm2429_vm4, 0, %v618_v47  ;;  %v845_v2 = vshll.u32 %v721_v34, 16  ;;  %v630_v24 = vshll.u32 %v2433_v46, 16 }
  0xda   : > { %v562_v23 = vor.u32 %v560_v39, %v559_v60  ;;  %v713_v38 = vsel %vm2429_vm4, %v559_v60, 0  ;;  %v2548_v18 = vpack.c.bf16 %v512_v10, %v511_v19  ;;  %v840_v16 = vshll.u32 %v2543_v17, 16 }
  0xdb   : > { %v535_v28 = vpack.c.bf16 %v506_v20, %v505_v58  ;;  %v749_v14 = vshll.u32 %v713_v38, 16  ;;  %v622_v54 = vrot.slane %v620_v61, 7  ;;  %v623_v62 = vshll.u32 %v543_v44, 16 }
  0xdc   : > { %v2553_v59 = vsel %vm2429_vm4, 0, %v562_v23  ;;  %v2555_v29 = vpack.c.bf16 %v528_v63, %v527_v4  ;;  %v838_v3 = vshrl.u32 %v2543_v17, 16  ;;  %v842_v50 = vrot.slane %v840_v16, 1 }
  0xdd   : > { %v744_v41 = vshll.u32 %v2553_v59, 16  ;;  %v847_v46 = vrot.slane %v845_v2, 1  ;;  %v625_v19 = vor.u32 %v623_v62, %v622_v54  ;;  %v722_v1 = vsel %vm2429_vm4, %v622_v54, 0 }
  0xde   : > { %v629_v10 = vrot.slane %v627_v8, 7  ;;  %v843_v33 = vor.u32 %v842_v50, %v838_v3  ;;  %v742_v35 = vshrl.u32 %v2553_v59, 16  ;;  %v564_v40 = vshrl.u32 %v535_v28, 16 }
  0xdf   : > { %v746_v22 = vrot.slane %v744_v41, 1  ;;  %v751_v9 = vrot.slane %v749_v14, 1  ;;  %v1013_v43 = vrot.slane %v2543_v17, 1  ;;  %v1014_v36 = vrot.slane %v721_v34, 1 }
  0xe0   : > { %v2565_v48 = vsel %vm2429_vm4, 0, %v625_v19  ;;  %v848_v5 = vsel %vm728_vm6, %v843_v33, %v847_v46  ;;  %v857_v7 = vshll.u32 %v722_v1, 16  ;;  %v989_v49 = vrot.slane %v2553_v59, 1 }
  0xe1   : > { %v747_v55 = vor.u32 %v746_v22, %v742_v35  ;;  %v852_v6 = vshll.u32 %v2565_v48, 16  ;;  %939 = vrot.lane.b32.xlu0 %v848_v5, %s1998_s5  ;;  %v566_v39 = vrot.slane %v564_v40, 7  ;;  %v567_v44 = vshll.u32 %v535_v28, 16 }
  0xe2   : > { %v632_v52 = vor.u32 %v630_v24, %v629_v10  ;;  %v850_v58 = vshrl.u32 %v2565_v48, 16  ;;  %v573_v34 = vrot.slane %v571_v12, 7  ;;  %v990_v60 = vrot.slane %v713_v38, 1 }
  0xe3   : > { %v752_v37 = vsel %vm728_vm6, %v747_v55, %v751_v9  ;;  %v854_v47 = vrot.slane %v852_v6, 1  ;;  %v569_v20 = vor.u32 %v567_v44, %v566_v39  ;;  %v714_v8 = vsel %vm2429_vm4, %v566_v39, 0 }
  0xe4   : > { %923 = vrot.lane.b32.xlu1 %v752_v37, %s1998_s5  ;;  %v2580_v4 = vsel %vm2429_vm4, 0, %v632_v52  ;;  %v1015_v63 = vsel %vm985_vm5, %v1013_v43, %v1014_v36  ;;  %v859_v2 = vrot.slane %v857_v7, 1  ;;  %v2585_v23 = vsel %vm2429_vm4, %v629_v10, 0  ;;  %v3274_v7 = vld [vmem:[#allocation15_spill] sm:$0xff]  ;;  %v3275_v52 = vld [vmem:[#allocation16_spill] sm:$0xff] }
  0xe5   : > { %v855_v61 = vor.u32 %v854_v47, %v850_v58  ;;  %1052 = vrot.lane.b32.xlu0 %v1015_v63, %s1997_s4  ;;  %v2590_v12 = vsel %vm2429_vm4, 0, %v569_v20  ;;  %v1016_v38 = vrot.slane %v2565_v48, 1  ;;  %v864_v24 = vshll.u32 %v2580_v4, 16  ;;  %v3276_v63 = vld [vmem:[#allocation9_spill] sm:$0xff] }
  0xe6   : > { %v576_v16 = vor.u32 %v574_v13, %v573_v34  ;;  %v585_v28 = vshrl.u32 %v2548_v18, 16  ;;  %v991_v14 = vsel %vm985_vm5, %v989_v49, %v990_v60  ;;  %v756_v54 = vshll.u32 %v2590_v12, 16 }
  0xe7   : > { %v761_v62 = vshll.u32 %v714_v8, 16  ;;  %v860_v3 = vsel %vm728_vm6, %v855_v61, %v859_v2  ;;  %v1017_v50 = vrot.slane %v722_v1, 1  ;;  %v869_v41 = vshll.u32 %v2585_v23, 16  ;;  %v3277_v2 = vld [vmem:[#allocation10_spill] sm:$0xff] }
  0xe8   : > { %1036 = vrot.lane.b32.xlu1 %v991_v14, %s1997_s4  ;;  %v2604_v46 = vsel %vm2429_vm4, 0, %v576_v16  ;;  %v754_v15 = vshrl.u32 %v2590_v12, 16  ;;  %v758_v13 = vrot.slane %v756_v54, 1  ;;  %v866_v19 = vrot.slane %v864_v24, 1 }
  0xe9   : > { %v768_v10 = vshll.u32 %v2604_v46, 16  ;;  %v641_v33 = vshrl.u32 %v2555_v29, 16  ;;  %v644_v35 = vshll.u32 %v2555_v29, 16  ;;  %941 = vrot.lane.b32.xlu0 %v860_v3, %s1998_s5  ;;  %v1018_v1 = vsel %vm985_vm5, %v1016_v38, %v1017_v50 }
  0xea   : > { %v993_v22 = vrot.slane %v714_v8, 1  ;;  %v759_v40 = vor.u32 %v758_v13, %v754_v15  ;;  %v763_v9 = vrot.slane %v761_v62, 1  ;;  %v862_v43 = vshrl.u32 %v2580_v4, 16 }
  0xeb   : > { %v715_v36 = vsel %vm2429_vm4, %v573_v34, 0  ;;  %v992_v5 = vrot.slane %v2590_v12, 1  ;;  %v871_v55 = vrot.slane %v869_v41, 1  ;;  %v770_v6 = vrot.slane %v768_v10, 1 }
  0xec   : > { %v492_v29 = vsel %vm202_vm0, %v3274_v7, %v2336_v26  ;;  %v764_v49 = vsel %vm728_vm6, %v759_v40, %v763_v9  ;;  %v867_v39 = vor.u32 %v866_v19, %v862_v43  ;;  %v766_v44 = vshrl.u32 %v2604_v46, 16 }
  0xed   : > { %v493_v37 = vsel %vm202_vm0, %v3275_v52, %v2334_v51  ;;  %925 = vrot.lane.b32.xlu1 %v764_v49, %s1998_s5  ;;  %1054 = vrot.lane.b32.xlu0 %v1018_v1, %s1997_s4  ;;  %v773_v58 = vshll.u32 %v715_v36, 16  ;;  %v525_v47 = vsel %vm500_vm1, %v492_v29, %v1893_v25  ;;  %v643_v60 = vrot.slane %v641_v33, 7 }
  0xee   : > { %v526_v34 = vsel %vm500_vm1, %v493_v37, %v1893_v25  ;;  %v1019_v20 = vrot.slane %v2580_v4, 1  ;;  %v476_v61 = vsel %vm202_vm0, %v3276_v63, %v2336_v26  ;;  %v477_v38 = vsel %vm202_vm0, %v3277_v2, %v2334_v51 }
  0xef   : > { %v545_v8 = vpack.c.bf16 %v526_v34, %v525_v47  ;;  %v771_v24 = vor.u32 %v770_v6, %v766_v44  ;;  %v509_v16 = vsel %vm500_vm1, %v476_v61, %v1892_v53  ;;  %v510_v25 = vsel %vm500_vm1, %v477_v38, %v1892_v53 }
  0xf0   : > { %v646_v14 = vor.u32 %v644_v35, %v643_v60  ;;  %v994_v54 = vsel %vm985_vm5, %v992_v5, %v993_v22  ;;  %v872_v62 = vsel %vm728_vm6, %v867_v39, %v871_v55  ;;  %v537_v26 = vpack.c.bf16 %v510_v25, %v509_v16 }
  0xf1   : > { %v634_v3 = vshrl.u32 %v545_v8, 16  ;;  %v588_v50 = vshll.u32 %v2548_v18, 16  ;;  %1038 = vrot.lane.b32.xlu1 %v994_v54, %s1997_s4  ;;  %943 = vrot.lane.b32.xlu0 %v872_v62, %s1998_s5  ;;  %v775_v51 = vrot.slane %v773_v58, 1  ;;  %v1020_v41 = vrot.slane %v2585_v23, 1 }
  0xf2   : > { %v587_v15 = vrot.slane %v585_v28, 7  ;;  %v995_v31 = vrot.slane %v2604_v46, 1  ;;  %v637_v13 = vshll.u32 %v545_v8, 16  ;;  %v578_v19 = vshrl.u32 %v537_v26, 16 }
  0xf3   : > { %v636_v53 = vrot.slane %v634_v3, 7  ;;  %v776_v10 = vsel %vm728_vm6, %v771_v24, %v775_v51  ;;  %v1021_v33 = vsel %vm985_vm5, %v1019_v20, %v1020_v41  ;;  %v2656_v18 = vsel %vm2429_vm4, 0, %v646_v14 }
  0xf4   : > { %v590_v35 = vor.u32 %v588_v50, %v587_v15  ;;  %v580_v23 = vrot.slane %v578_v19, 7  ;;  %v581_v28 = vshll.u32 %v537_v26, 16  ;;  %v651_v40 = vshll.u32 %v2381_v56, 16 }
  0xf5   : > { %v639_v1 = vor.u32 %v637_v13, %v636_v53  ;;  %v724_v22 = vsel %vm2429_vm4, %v636_v53, 0  ;;  %v599_v9 = vshrl.u32 %v2467_v32, 16  ;;  %v602_v43 = vshll.u32 %v2467_v32, 16  ;;  %927 = vrot.lane.b32.xlu1 %v776_v10, %s1998_s5  ;;  %1056 = vrot.lane.b32.xlu0 %v1021_v33, %s1997_s4 }
  0xf6   : > { %v996_v5 = vrot.slane %v715_v36, 1  ;;  %v583_v6 = vor.u32 %v581_v28, %v580_v23  ;;  %v716_v7 = vsel %vm2429_vm4, %v580_v23, 0  ;;  %v888_v29 = vshll.u32 %v2656_v18, 16 }
  0xf7   : > { %v2667_v55 = vsel %vm2429_vm4, 0, %v639_v1  ;;  %v655_v49 = vshrl.u32 %v2469_v0, 16  ;;  %v881_v44 = vshll.u32 %v724_v22, 16  ;;  %v2676_v52 = vsel %vm2429_vm4, 0, %v590_v35 }
  0xf8   : > { %v876_v39 = vshll.u32 %v2667_v55, 16  ;;  %v997_v36 = vsel %vm985_vm5, %v995_v31, %v996_v5  ;;  %v2681_v37 = vsel %vm2429_vm4, 0, %v583_v6  ;;  %v725_v58 = vsel %vm2429_vm4, %v643_v60, 0 }
  0xf9   : > { %v650_v47 = vrot.slane %v648_v11, 7  ;;  %1040 = vrot.lane.b32.xlu1 %v997_v36, %s1997_s4  ;;  %v874_v34 = vshrl.u32 %v2667_v55, 16  ;;  %v780_v8 = vshll.u32 %v2681_v37, 16  ;;  %v785_v63 = vshll.u32 %v716_v7, 16 }
  0xfa   : > { %v878_v20 = vrot.slane %v876_v39, 1  ;;  %v658_v61 = vshll.u32 %v2469_v0, 16  ;;  %v890_v2 = vrot.slane %v888_v29, 1  ;;  %v2693_v38 = vsel %vm2429_vm4, %v587_v15, 0 }
  0xfb   : > { %v792_v60 = vshll.u32 %v2676_v52, 16  ;;  %v883_v56 = vrot.slane %v881_v44, 1  ;;  %v778_v11 = vshrl.u32 %v2681_v37, 16  ;;  %v782_v16 = vrot.slane %v780_v8, 1 }
  0xfc   : > { %v879_v24 = vor.u32 %v878_v20, %v874_v34  ;;  %v1022_v25 = vrot.slane %v2667_v55, 1  ;;  %v886_v14 = vshrl.u32 %v2656_v18, 16  ;;  %v893_v54 = vshll.u32 %v725_v58, 16 }
  0xfd   : > { %v1026_v62 = vrot.slane %v725_v58, 1  ;;  %v783_v3 = vor.u32 %v782_v16, %v778_v11  ;;  %v787_v26 = vrot.slane %v785_v63, 1  ;;  %v653_v50 = vor.u32 %v651_v40, %v650_v47 }
  0xfe   : > { %v884_v0 = vsel %vm728_vm6, %v879_v24, %v883_v56  ;;  %v891_v51 = vor.u32 %v890_v2, %v886_v14  ;;  %v794_v41 = vrot.slane %v792_v60, 1  ;;  %v797_v15 = vshll.u32 %v2693_v38, 16 }
  0xff   : > { %945 = vrot.lane.b32.xlu0 %v884_v0, %s1998_s5  ;;  %v594_v31 = vrot.slane %v592_v45, 7  ;;  %v788_v53 = vsel %vm728_vm6, %v783_v3, %v787_v26  ;;  %v1023_v13 = vrot.slane %v724_v22, 1  ;;  %v998_v19 = vrot.slane %v2681_v37, 1 }
 0x100   : > { %v2708_v10 = vsel %vm2429_vm4, 0, %v653_v50  ;;  %929 = vrot.lane.b32.xlu1 %v788_v53, %s1998_s5  ;;  %v999_v33 = vrot.slane %v716_v7, 1  ;;  %v895_v35 = vrot.slane %v893_v54, 1  ;;  %v790_v1 = vshrl.u32 %v2676_v52, 16 }
 0x101   : > { %v597_v23 = vor.u32 %v595_v21, %v594_v31  ;;  %v1024_v45 = vsel %vm985_vm5, %v1022_v25, %v1023_v13  ;;  %v1025_v28 = vrot.slane %v2656_v18, 1  ;;  %v900_v22 = vshll.u32 %v2708_v10, 16 }
 0x102   : > { %v657_v40 = vrot.slane %v655_v49, 7  ;;  %v896_v5 = vsel %vm728_vm6, %v891_v51, %v895_v35  ;;  %v795_v6 = vor.u32 %v794_v41, %v790_v1  ;;  %v726_v7 = vsel %vm2429_vm4, %v650_v47, 0 }
 0x103   : > { %1058 = vrot.lane.b32.xlu0 %v1024_v45, %s1997_s4  ;;  %v2723_v29 = vsel %vm2429_vm4, 0, %v597_v23  ;;  %v1000_v30 = vsel %vm985_vm5, %v998_v19, %v999_v33  ;;  %v799_v21 = vrot.slane %v797_v15, 1  ;;  %v1001_v39 = vrot.slane %v2676_v52, 1 }
 0x104   : > { %v804_v44 = vshll.u32 %v2723_v29, 16  ;;  %1042 = vrot.lane.b32.xlu1 %v1000_v30, %s1997_s4  ;;  %v1002_v49 = vrot.slane %v2693_v38, 1  ;;  %v718_v36 = vsel %vm2429_vm4, %v594_v31, 0  ;;  %v660_v58 = vor.u32 %v658_v61, %v657_v40 }
 0x105   : > { %v727_v47 = vsel %vm2429_vm4, %v657_v40, 0  ;;  %v1027_v34 = vsel %vm985_vm5, %v1025_v28, %v1026_v62  ;;  %v902_v20 = vrot.slane %v900_v22, 1  ;;  %v905_v8 = vshll.u32 %v726_v7, 16 }
 0x106   : > { %v601_v63 = vrot.slane %v599_v9, 7  ;;  %v800_v2 = vsel %vm728_vm6, %v795_v6, %v799_v21  ;;  %v898_v38 = vshrl.u32 %v2708_v10, 16  ;;  %v806_v60 = vrot.slane %v804_v44, 1 }
 0x107   : > { %947 = vrot.lane.b32.xlu0 %v896_v5, %s1998_s5  ;;  %v2742_v61 = vsel %vm2429_vm4, 0, %v660_v58  ;;  %v802_v24 = vshrl.u32 %v2723_v29, 16  ;;  %v809_v56 = vshll.u32 %v718_v36, 16  ;;  %v917_v16 = vshll.u32 %v727_v47, 16  ;;  %v1911_v58 = vld [vmem:[%s3235_s1 + $0x70] ss:$8 sps:$4 sm:$0xff]  }
 0x108   : > { %v912_v11 = vshll.u32 %v2742_v61, 16  ;;  %931 = vrot.lane.b32.xlu1 %v800_v2, %s1998_s5  ;;  %v604_v9 = vor.u32 %v602_v43, %v601_v63  ;;  %v719_v25 = vsel %vm2429_vm4, %v601_v63, 0  ;;  %v1031_v14 = vrot.slane %v2742_v61, 1  ;;  %v1918_v63 = vld [vmem:[%s3235_s1 + $0x44] ss:$8 sps:$4 sm:$0xff]  }
 0x109   : > { %v1032_v54 = vrot.slane %v727_v47, 1  ;;  %v1003_v62 = vsel %vm985_vm5, %v1001_v39, %v1002_v49  ;;  %v903_v0 = vor.u32 %v902_v20, %v898_v38  ;;  %v910_v3 = vshrl.u32 %v2742_v61, 16  ;;  %v1912_v47 = vld [vmem:[%s3235_s1 + $0x64] ss:$8 sps:$4 sm:$0xff]   ;;  %v1915_v20 = vld [vmem:[%s3235_s1 + $0x54] ss:$8 sps:$4 sm:$0xff]  }
 0x10a   : > { %v914_v26 = vrot.slane %v912_v11, 1  ;;  %v907_v50 = vrot.slane %v905_v8, 1  ;;  %v807_v51 = vor.u32 %v806_v60, %v802_v24  ;;  %v2757_v32 = vsel %vm2429_vm4, 0, %v604_v9  ;;  %v1917_v8 = vld [vmem:[%s3235_s1 + $0x50] ss:$8 sps:$4 sm:$0xff]  }
 0x10b   : > { %1060 = vrot.lane.b32.xlu0 %v1027_v34, %s1997_s4  ;;  %v1033_v43 = vsel %vm985_vm5, %v1031_v14, %v1032_v54  ;;  %v919_v15 = vrot.slane %v917_v16, 1  ;;  %v816_v31 = vshll.u32 %v2757_v32, 16  ;;  %v821_v53 = vshll.u32 %v719_v25, 16  ;;  %v1914_v34 = vld [vmem:[%s3235_s1 + $0x60] ss:$8 sps:$4 sm:$0xff]  }
 0x10c   : > { %v915_v41 = vor.u32 %v914_v26, %v910_v3  ;;  %1044 = vrot.lane.b32.xlu1 %v1003_v62, %s1997_s4  ;;  %v811_v13 = vrot.slane %v809_v56, 1  ;;  %v1028_v19 = vrot.slane %v2708_v10, 1  ;;  %v1007_v33 = vrot.slane %v2757_v32, 1  ;;  %v1920_v2 = vld [vmem:[%s3235_s1 + $0x40] ss:$8 sps:$4 sm:$0xff]  }
 0x10d   : > { %v1008_v35 = vrot.slane %v719_v25, 1  ;;  %v908_v1 = vsel %vm728_vm6, %v903_v0, %v907_v50  ;;  %v814_v23 = vshrl.u32 %v2757_v32, 16  ;;  %v818_v45 = vrot.slane %v816_v31, 1  ;;  %v1921_v38 = vld [vmem:[%s3235_s1 + $0x34] ss:$8 sps:$4 sm:$0xff]  }
 0x10e   : > { %v920_v27 = vsel %vm728_vm6, %v915_v41, %v919_v15  ;;  %v1029_v28 = vrot.slane %v726_v7, 1  ;;  %v812_v40 = vsel %vm728_vm6, %v807_v51, %v811_v13  ;;  %v1004_v5 = vrot.slane %v2723_v29, 1  ;;  %v1923_v60 = vld [vmem:[%s3235_s1 + $0x30] ss:$8 sps:$4 sm:$0xff]   ;;  %v1924_v24 = vld [vmem:[%s3235_s1 + $0x24] ss:$8 sps:$4 sm:$0xff]  }
 0x10f   : > { %949 = vrot.lane.b32.xlu0 %v908_v1, %s1998_s5  ;;  %v1009_v22 = vsel %vm985_vm5, %v1007_v33, %v1008_v35  ;;  %v819_v6 = vor.u32 %v818_v45, %v814_v23  ;;  %v823_v30 = vrot.slane %v821_v53, 1  ;;  %v1005_v39 = vrot.slane %v718_v36, 1  ;;  %v1909_v36 = vld [vmem:[%s3235_s1 + $0x74] ss:$8 sps:$4 sm:$0xff]   ;;  %v1926_v56 = vld [vmem:[%s3235_s1 + $0x20] ss:$8 sps:$4 sm:$0xff]  }
 0x110   : > { %933 = vrot.lane.b32.xlu1 %v812_v40, %s1998_s5  ;;  %v1030_v21 = vsel %vm985_vm5, %v1028_v19, %v1029_v28  ;;  %v1999_v7 = vmov 0   ;;  %1421 = vmatprep.subr.bf16.mxu0 %v1909_v36  ;;  %v1927_v11 = vld [vmem:[%s3235_s1 + $0x14] ss:$8 sps:$4 sm:$0xff]   ;;  %v1929_v16 = vld [vmem:[%s3235_s1 + $0x10] ss:$8 sps:$4 sm:$0xff]  }
 0x111   : > { %v824_v44 = vsel %vm728_vm6, %v819_v6, %v823_v30  ;;  %v1006_v49 = vsel %vm985_vm5, %v1004_v5, %v1005_v39  ;;  %1453 = vmatprep.mubr.bf16.mxu0 %v1999_v7  ;;  %1533 = vmatprep.mubr.bf16.mxu1 %v1999_v7  ;;  %v1930_v9 = vld [vmem:[%s3235_s1 + $0x4] ss:$8 sps:$4 sm:$0xff]   ;;  %v1932_v25 = vld [vmem:[%s3235_s1] ss:$8 sps:$4 sm:$0xff]  }
 0x112   : > { %1800 = vmatprep.subr.bf16.mxu1 %v1909_v36  ;;  %1422 = vmatpush1.bf16.msra.mxu0 %v1911_v58 }
 0x113   : > { %1062 = vrot.lane.b32.xlu0 %v1030_v21, %s1997_s4  ;;  %1808 = vmatpush1.bf16.msra.mxu1 %v1911_v58 }
 0x114   : > { %1046 = vrot.lane.b32.xlu1 %v1006_v49, %s1997_s4  ;;  %1423 = vmatprep.subr.bf16.mxu0 %v1912_v47 }
 0x115   : > { %1801 = vmatprep.subr.bf16.mxu1 %v1912_v47 }
 0x116   : > { %1424 = vmatpush1.bf16.msra.mxu0 %v1914_v34 }
 0x117   : > { %951 = vrot.lane.b32.xlu0 %v920_v27, %s1998_s5  ;;  %1809 = vmatpush1.bf16.msra.mxu1 %v1914_v34 }
 0x118   : > { %935 = vrot.lane.b32.xlu1 %v824_v44, %s1998_s5  ;;  %1425 = vmatprep.subr.bf16.mxu0 %v1915_v20 }
 0x119   : > { %1802 = vmatprep.subr.bf16.mxu1 %v1915_v20 }
 0x11a   : > { %1426 = vmatpush1.bf16.msra.mxu0 %v1917_v8 }
 0x11b   : > { %1064 = vrot.lane.b32.xlu0 %v1033_v43, %s1997_s4  ;;  %1810 = vmatpush1.bf16.msra.mxu1 %v1917_v8 }
 0x11c   : > { %1048 = vrot.lane.b32.xlu1 %v1009_v22, %s1997_s4  ;;  %1427 = vmatprep.subr.bf16.mxu0 %v1918_v63  ;;  %s161_s4 = sand.u32 1, %s1985_s13  }
 0x11d   : > { %1803 = vmatprep.subr.bf16.mxu1 %v1918_v63  ;;  %s1758_s7 = sshll.u32 %s161_s4, 9  ;;  %s3194_s16 = scalar_lea.sflag [#allocation3], %s161_s4 }
 0x11e   : > { %1428 = vmatpush1.bf16.msra.mxu0 %v1920_v2  ;;  %s3055_s8 = scalar_lea.vmem [#allocation2], %s1758_s7 }
 0x11f   : > { %1811 = vmatpush1.bf16.msra.mxu1 %v1920_v2  ;;  %1429 = vmatprep.subr.bf16.mxu0 %v1921_v38  ;;  %s1692_s10 = sshll.u32 %s3055_s8, 4  ;;  %s3186_s10 = int_to_ptr.vmem [resolvable:$true] %s1692_s10 }
 0x120   : > { %1804 = vmatprep.subr.bf16.mxu1 %v1921_v38  ;;  %s1933_s20 = scalar_lea.vmem %s3186_s10, 8192  ;;  %p1940_p0 = scmp.lt.s32.totalorder %s3186_s10, %s1938_s25 }
 0x121   : > { %p1934_p11 = scmp.ne.s32.totalorder %s3186_s10, %s1933_s20  ;;  %p1941_p1 = scmp.lt.s32.totalorder %s1939_s26, %s1933_s20 }
 0x122   : > { %1430 = vmatpush1.bf16.msra.mxu0 %v1923_v60 }
 0x123   : > { %1812 = vmatpush1.bf16.msra.mxu1 %v1923_v60  ;;  %1431 = vmatprep.subr.bf16.mxu0 %v1924_v24  ;;  %p1935_p12 = pnand %p1934_p11, %p2063_p5  ;;  %p1942_p2 = por %p1941_p1, %p1940_p0 }
 0x124   : > { %1805 = vmatprep.subr.bf16.mxu1 %v1924_v24 }
 0x125   : > { %p1936_p13 = pneg %p1935_p12 }
 0x126   : > { %1432 = vmatpush1.bf16.msra.mxu0 %v1926_v56 }
 0x127   : > { %1813 = vmatpush1.bf16.msra.mxu1 %v1926_v56  ;;  %1433 = vmatprep.subr.bf16.mxu0 %v1927_v11  ;;  %p1943_p3 = pnand %p1942_p2, %p1936_p13 }
 0x128   : > { %1806 = vmatprep.subr.bf16.mxu1 %v1927_v11 }
 0x12a   : > { %1434 = vmatpush1.bf16.msra.mxu0 %v1929_v16 }
 0x12b   : > { %1814 = vmatpush1.bf16.msra.mxu1 %v1929_v16  ;;  %1435 = vmatprep.subr.bf16.mxu0 %v1930_v9 }
 0x12c   : > { %1807 = vmatprep.subr.bf16.mxu1 %v1930_v9 }
 0x12e   : > { %1436 = vmatpush1.bf16.msra.mxu0 %v1932_v25 }
 0x12f   : > { %1815 = vmatpush1.bf16.msra.mxu1 %v1932_v25 }
 0x140   : > { %v1051_v14 = vpop.permute.xlu0 %1050 }
 0x142   : > { %v1035_v54 = vpop.permute.xlu1 %1034 }
 0x146   : > { %v938_v62 = vpop.permute.xlu0 %937 }
 0x147   : > { %v1084_v0 = vsel %vm1066_vm7, %v2453_v57, %v938_v62  ;;  %v922_v3 = vpop.permute.xlu1 %921 }
 0x148   : > { %v1068_v26 = vsel %vm1066_vm7, %v2457_v42, %v922_v3  ;;  %v2836_v50 = vsel %vm1099_vm8, %v1084_v0, %v1051_v14 }
 0x149   : > { %1164 = vrot.lane.b32.xlu0 %v2836_v50, %s2000_s29  ;;  %v2841_v51 = vsel %vm1099_vm8, %v1068_v26, %v1035_v54 }
 0x14a   : > { %1148 = vrot.lane.b32.xlu1 %v2841_v51, %s2000_s29 }
 0x153   : > { %v940_v43 = vpop.permute.xlu0 %939 }
 0x154   : > { %v1086_v57 = vsel %vm1066_vm7, %v2543_v17, %v940_v43 }
 0x156   : > { %v924_v41 = vpop.permute.xlu1 %923 }
 0x157   : > { %v1053_v15 = vpop.permute.xlu0 %1052  ;;  %v1070_v31 = vsel %vm1066_vm7, %v2553_v59, %v924_v41 }
 0x158   : > { %v2848_v42 = vsel %vm1099_vm8, %v1086_v57, %v1053_v15 }
 0x159   : > { %1197 = vrot.lane.b32.xlu0 %v2848_v42, %s2001_s30 }
 0x15a   : > { %v1037_v53 = vpop.permute.xlu1 %1036 }
 0x15b   : > { %v2855_v13 = vsel %vm1099_vm8, %v1070_v31, %v1037_v53  ;;  %v942_v19 = vpop.permute.xlu0 %941 }
 0x15c   : > { %1181 = vrot.lane.b32.xlu1 %v2855_v13, %s2001_s30  ;;  %v1088_v17 = vsel %vm1066_vm7, %v2565_v48, %v942_v19 }
 0x15d   : > { %1166 = vrot.lane.b32.xlu0 %v2848_v42, %s2000_s29 }
 0x15f   : > { %v926_v33 = vpop.permute.xlu1 %925  ;;  %v1055_v59 = vpop.permute.xlu0 %1054 }
 0x160   : > { %1150 = vrot.lane.b32.xlu1 %v2855_v13, %s2000_s29  ;;  %v2866_v35 = vsel %vm1099_vm8, %v1088_v17, %v1055_v59  ;;  %v1072_v1 = vsel %vm1066_vm7, %v2590_v12, %v926_v33 }
 0x161   : > { %1199 = vrot.lane.b32.xlu0 %v2866_v35, %s2001_s30 }
 0x163   : > { %v1039_v27 = vpop.permute.xlu1 %1038  ;;  %v944_v23 = vpop.permute.xlu0 %943 }
 0x164   : > { %v2873_v45 = vsel %vm1099_vm8, %v1072_v1, %v1039_v27  ;;  %v1090_v48 = vsel %vm1066_vm7, %v2580_v4, %v944_v23 }
 0x165   : > { %1183 = vrot.lane.b32.xlu1 %v2873_v45, %s2001_s30  ;;  %1168 = vrot.lane.b32.xlu0 %v2866_v35, %s2000_s29 }
 0x167   : > { %v928_v28 = vpop.permute.xlu1 %927  ;;  %v1057_v22 = vpop.permute.xlu0 %1056 }
 0x168   : > { %v2882_v40 = vsel %vm1099_vm8, %v1090_v48, %v1057_v22  ;;  %v1074_v12 = vsel %vm1066_vm7, %v2604_v46, %v928_v28 }
 0x169   : > { %1152 = vrot.lane.b32.xlu1 %v2873_v45, %s2000_s29  ;;  %1201 = vrot.lane.b32.xlu0 %v2882_v40, %s2001_s30 }
 0x16b   : > { %v1041_v5 = vpop.permute.xlu1 %1040 }
 0x16c   : > { %v2891_v6 = vsel %vm1099_vm8, %v1074_v12, %v1041_v5 }
 0x16d   : > { %1185 = vrot.lane.b32.xlu1 %v2891_v6, %s2001_s30  ;;  %1170 = vrot.lane.b32.xlu0 %v2882_v40, %s2000_s29 }
 0x171   : > { %v946_v4 = vpop.permute.xlu0 %945  ;;  %1154 = vrot.lane.b32.xlu1 %v2891_v6, %s2000_s29 }
 0x172   : > { %v930_v30 = vpop.permute.xlu1 %929  ;;  %v1092_v21 = vsel %vm1066_vm7, %v2667_v55, %v946_v4 }
 0x173   : > { %v1076_v44 = vsel %vm1066_vm7, %v2681_v37, %v930_v30 }
 0x175   : > { %v1059_v39 = vpop.permute.xlu0 %1058 }
 0x176   : > { %v2902_v46 = vsel %vm1099_vm8, %v1092_v21, %v1059_v39  ;;  %v1043_v49 = vpop.permute.xlu1 %1042 }
 0x177   : > { %1203 = vrot.lane.b32.xlu0 %v2902_v46, %s2001_s30  ;;  %v2909_v36 = vsel %vm1099_vm8, %v1076_v44, %v1043_v49 }
 0x178   : > { %1187 = vrot.lane.b32.xlu1 %v2909_v36, %s2001_s30 }
 0x179   : > { %v948_v58 = vpop.permute.xlu0 %947 }
 0x17a   : > { %v932_v47 = vpop.permute.xlu1 %931  ;;  %v1094_v55 = vsel %vm1066_vm7, %v2656_v18, %v948_v58 }
 0x17b   : > { %1172 = vrot.lane.b32.xlu0 %v2902_v46, %s2000_s29  ;;  %v1078_v20 = vsel %vm1066_vm7, %v2676_v52, %v932_v47 }
 0x17c   : > { %1156 = vrot.lane.b32.xlu1 %v2909_v36, %s2000_s29 }
 0x17d   : > { %v1061_v37 = vpop.permute.xlu0 %1060 }
 0x17e   : > { %v2920_v34 = vsel %vm1099_vm8, %v1094_v55, %v1061_v37  ;;  %v1045_v8 = vpop.permute.xlu1 %1044 }
 0x17f   : > { %1205 = vrot.lane.b32.xlu0 %v2920_v34, %s2001_s30  ;;  %v2927_v63 = vsel %vm1099_vm8, %v1078_v20, %v1045_v8 }
 0x180   : > { %1189 = vrot.lane.b32.xlu1 %v2927_v63, %s2001_s30 }
 0x181   : > { %v950_v18 = vpop.permute.xlu0 %949 }
 0x182   : > { %v934_v2 = vpop.permute.xlu1 %933  ;;  %v1096_v38 = vsel %vm1066_vm7, %v2708_v10, %v950_v18 }
 0x183   : > { %1174 = vrot.lane.b32.xlu0 %v2920_v34, %s2000_s29  ;;  %v1080_v24 = vsel %vm1066_vm7, %v2723_v29, %v934_v2 }
 0x184   : > { %1158 = vrot.lane.b32.xlu1 %v2927_v63, %s2000_s29 }
 0x185   : > { %v1063_v52 = vpop.permute.xlu0 %1062 }
 0x186   : > { %v2938_v60 = vsel %vm1099_vm8, %v1096_v38, %v1063_v52  ;;  %v1047_v56 = vpop.permute.xlu1 %1046 }
 0x187   : > { %1207 = vrot.lane.b32.xlu0 %v2938_v60, %s2001_s30  ;;  %v2945_v11 = vsel %vm1099_vm8, %v1080_v24, %v1047_v56 }
 0x188   : > { %1191 = vrot.lane.b32.xlu1 %v2945_v11, %s2001_s30 }
 0x189   : > { %v952_v10 = vpop.permute.xlu0 %951 }
 0x18a   : > { %v936_v16 = vpop.permute.xlu1 %935  ;;  %v1098_v9 = vsel %vm1066_vm7, %v2742_v61, %v952_v10 }
 0x18b   : > { %1176 = vrot.lane.b32.xlu0 %v2938_v60, %s2000_s29  ;;  %v1082_v14 = vsel %vm1066_vm7, %v2757_v32, %v936_v16 }
 0x18c   : > { %1160 = vrot.lane.b32.xlu1 %v2945_v11, %s2000_s29 }
 0x18d   : > { %v1065_v29 = vpop.permute.xlu0 %1064 }
 0x18e   : > { %v1131_v25 = vsel %vm1099_vm8, %v1098_v9, %v1065_v29  ;;  %v1049_v54 = vpop.permute.xlu1 %1048 }
 0x18f   : > { %1209 = vrot.lane.b32.xlu0 %v1131_v25, %s2001_s30  ;;  %v1115_v62 = vsel %vm1099_vm8, %v1082_v14, %v1049_v54 }
 0x190   : > { %1193 = vrot.lane.b32.xlu1 %v1115_v62, %s2001_s30 }
 0x193   : > { %1178 = vrot.lane.b32.xlu0 %v1131_v25, %s2000_s29 }
 0x194   : > { %1162 = vrot.lane.b32.xlu1 %v1115_v62, %s2000_s29 }
 0x197   : > { %1211 = vrot.lane.b32.xlu0 %v1999_v7, %s2001_s30 }
 0x198   : > { %1195 = vrot.lane.b32.xlu1 %v2836_v50, %s2001_s30 }
 0x1bb   : > { %v1165_v61 = vpop.permute.xlu0 %1164 }
 0x1bc   : > { %v1149_v32 = vpop.permute.xlu1 %1148  ;;  %v1232_v0 = vsel %vm1213_vm9, %v1115_v62, %v1165_v61 }
 0x1bd   : > { %v1216_v43 = vsel %vm1213_vm9, 0, %v1149_v32 }
 0x1cb   : > { %v1198_v3 = vpop.permute.xlu0 %1197 }
 0x1cc   : > { %v1265_v26 = vsel %vm1247_vm10, %v1232_v0, %v1198_v3  ;;  %v1331_v3 = vlaneseq }
 0x1cd   : > { %1785 = vmatmul.mubr.msk.bf16.vlgmr.msra.gmra.mxu1 %vm1280_vm11, %v1265_v26 }
 0x1ce   : > { %v1182_v41 = vpop.permute.xlu1 %1181  ;;  %1543 = vmatprep.mubr.bf16.mxu1 %v1999_v7 }
 0x1cf   : > { %v1249_v57 = vsel %vm1247_vm10, %v1216_v43, %v1182_v41  ;;  %v1167_v15 = vpop.permute.xlu0 %1166 }
 0x1d0   : > { %1777 = vmatmul.mubr.msk.bf16.vlgmr.msra.gmra.mxu0 %vm1280_vm11, %v1249_v57  ;;  %v1234_v53 = vsel %vm1213_vm9, %v2836_v50, %v1167_v15 }
 0x1d1   : > { %1463 = vmatprep.mubr.bf16.mxu0 %v1999_v7 }
 0x1d2   : > { %v1151_v31 = vpop.permute.xlu1 %1150 }
 0x1d3   : > { %v1200_v19 = vpop.permute.xlu0 %1199  ;;  %v1218_v33 = vsel %vm1213_vm9, %v2841_v51, %v1151_v31 }
 0x1d4   : > { %v1267_v17 = vsel %vm1247_vm10, %v1234_v53, %v1200_v19 }
 0x1d5   : > { %1786 = vmatmul.mubr.msk.bf16.gmra.mxu1 %vm1280_vm11, %v1267_v17 }
 0x1d6   : > { %1553 = vmatprep.mubr.bf16.mxu1 %v1999_v7 }
 0x1d7   : > { %v1184_v59 = vpop.permute.xlu1 %1183  ;;  %v1169_v1 = vpop.permute.xlu0 %1168 }
 0x1d8   : > { %v1251_v27 = vsel %vm1247_vm10, %v1218_v33, %v1184_v59  ;;  %v1236_v50 = vsel %vm1213_vm9, %v2848_v42, %v1169_v1 }
 0x1d9   : > { %1778 = vmatmul.mubr.msk.bf16.gmra.mxu0 %vm1280_vm11, %v1251_v27 }
 0x1da   : > { %1473 = vmatprep.mubr.bf16.mxu0 %v1999_v7 }
 0x1db   : > { %v1153_v23 = vpop.permute.xlu1 %1152  ;;  %v1202_v48 = vpop.permute.xlu0 %1201 }
 0x1dc   : > { %v1269_v28 = vsel %vm1247_vm10, %v1236_v50, %v1202_v48  ;;  %v1220_v51 = vsel %vm1213_vm9, %v2855_v13, %v1153_v23 }
 0x1dd   : > { %1787 = vmatmul.mubr.msk.bf16.gmra.mxu1 %vm1280_vm11, %v1269_v28 }
 0x1de   : > { %1563 = vmatprep.mubr.bf16.mxu1 %v1999_v7 }
 0x1df   : > { %v1186_v22 = vpop.permute.xlu1 %1185  ;;  %v1171_v5 = vpop.permute.xlu0 %1170 }
 0x1e0   : > { %v1253_v12 = vsel %vm1247_vm10, %v1220_v51, %v1186_v22  ;;  %v1238_v4 = vsel %vm1213_vm9, %v2866_v35, %v1171_v5 }
 0x1e1   : > { %1779 = vmatmul.mubr.msk.bf16.gmra.mxu0 %vm1280_vm11, %v1253_v12 }
 0x1e2   : > { %1483 = vmatprep.mubr.bf16.mxu0 %v1999_v7 }
 0x1e3   : > { %v1155_v42 = vpop.permute.xlu1 %1154 }
 0x1e4   : > { %v1222_v39 = vsel %vm1213_vm9, %v2873_v45, %v1155_v42 }
 0x1e9   : > { %v1204_v30 = vpop.permute.xlu0 %1203 }
 0x1ea   : > { %v1271_v21 = vsel %vm1247_vm10, %v1238_v4, %v1204_v30  ;;  %v1188_v44 = vpop.permute.xlu1 %1187 }
 0x1eb   : > { %1788 = vmatmul.mubr.msk.bf16.gmra.mxu1 %vm1280_vm11, %v1271_v21  ;;  %v1255_v13 = vsel %vm1247_vm10, %v1222_v39, %v1188_v44 }
 0x1ec   : > { %1573 = vmatprep.mubr.bf16.mxu1 %v1999_v7  ;;  %1780 = vmatmul.mubr.msk.bf16.gmra.mxu0 %vm1280_vm11, %v1255_v13 }
 0x1ed   : > { %v1173_v49 = vpop.permute.xlu0 %1172  ;;  %1493 = vmatprep.mubr.bf16.mxu0 %v1999_v7 }
 0x1ee   : > { %v1157_v58 = vpop.permute.xlu1 %1156  ;;  %v1240_v35 = vsel %vm1213_vm9, %v2882_v40, %v1173_v49 }
 0x1ef   : > { %v1224_v45 = vsel %vm1213_vm9, %v2891_v6, %v1157_v58 }
 0x1f1   : > { %v1206_v47 = vpop.permute.xlu0 %1205 }
 0x1f2   : > { %v1273_v55 = vsel %vm1247_vm10, %v1240_v35, %v1206_v47  ;;  %v1190_v37 = vpop.permute.xlu1 %1189 }
 0x1f3   : > { %1789 = vmatmul.mubr.msk.bf16.gmra.mxu1 %vm1280_vm11, %v1273_v55  ;;  %v1257_v20 = vsel %vm1247_vm10, %v1224_v45, %v1190_v37 }
 0x1f4   : > { %1583 = vmatprep.mubr.bf16.mxu1 %v1999_v7  ;;  %1781 = vmatmul.mubr.msk.bf16.gmra.mxu0 %vm1280_vm11, %v1257_v20 }
 0x1f5   : > { %v1175_v8 = vpop.permute.xlu0 %1174  ;;  %1503 = vmatprep.mubr.bf16.mxu0 %v1999_v7 }
 0x1f6   : > { %v1159_v18 = vpop.permute.xlu1 %1158  ;;  %v1242_v40 = vsel %vm1213_vm9, %v2902_v46, %v1175_v8 }
 0x1f7   : > { %v1226_v6 = vsel %vm1213_vm9, %v2909_v36, %v1159_v18 }
 0x1f9   : > { %v1208_v2 = vpop.permute.xlu0 %1207 }
 0x1fa   : > { %v1275_v38 = vsel %vm1247_vm10, %v1242_v40, %v1208_v2  ;;  %v1192_v52 = vpop.permute.xlu1 %1191 }
 0x1fb   : > { %1790 = vmatmul.mubr.msk.bf16.gmra.mxu1 %vm1280_vm11, %v1275_v38  ;;  %v1259_v24 = vsel %vm1247_vm10, %v1226_v6, %v1192_v52 }
 0x1fc   : > { %1593 = vmatprep.mubr.bf16.mxu1 %v1999_v7  ;;  %1782 = vmatmul.mubr.msk.bf16.gmra.mxu0 %vm1280_vm11, %v1259_v24 }
 0x1fd   : > { %v1177_v56 = vpop.permute.xlu0 %1176  ;;  %1513 = vmatprep.mubr.bf16.mxu0 %v1999_v7 }
 0x1fe   : > { %v1161_v10 = vpop.permute.xlu1 %1160  ;;  %v1244_v46 = vsel %vm1213_vm9, %v2920_v34, %v1177_v56 }
 0x1ff   : > { %v1228_v36 = vsel %vm1213_vm9, %v2927_v63, %v1161_v10 }
 0x201   : > { %v1210_v16 = vpop.permute.xlu0 %1209 }
 0x202   : > { %v1277_v9 = vsel %vm1247_vm10, %v1244_v46, %v1210_v16  ;;  %v1194_v29 = vpop.permute.xlu1 %1193 }
 0x203   : > { %1791 = vmatmul.mubr.msk.bf16.gmra.mxu1 %vm1280_vm11, %v1277_v9  ;;  %v1261_v25 = vsel %vm1247_vm10, %v1228_v36, %v1194_v29 }
 0x204   : > { %1603 = vmatprep.mubr.bf16.mxu1 %v1999_v7  ;;  %1783 = vmatmul.mubr.msk.bf16.gmra.mxu0 %vm1280_vm11, %v1261_v25 }
 0x205   : > { %v1179_v14 = vpop.permute.xlu0 %1178  ;;  %1523 = vmatprep.mubr.bf16.mxu0 %v1999_v7  ;;  %v1332_v7 = vshrl.u32 %v1331_v3, 7 }
 0x206   : > { %v1163_v34 = vpop.permute.xlu1 %1162  ;;  %v1246_v54 = vsel %vm1213_vm9, %v2938_v60, %v1179_v14  ;;  %v1329_v60 = vld [vmem:[%s3236_s2] sm:$0x3] }
 0x207   : > { %v1230_v61 = vsel %vm1213_vm9, %v2945_v11, %v1163_v34  ;;  %v1333_v26 = vsub.s32 0, %v1332_v7  ;;  %v1337_v43 = vsub.s32 1, %v1332_v7 }
 0x209   : > { %v1212_v62 = vpop.permute.xlu0 %1211  ;;  %v3049_v41 = vrot.slane %v1329_v60, %v1333_v26  ;;  %v3051_v11 = vrot.slane %v1329_v60, %v1337_v43 }
 0x20a   : > { %v1279_v63 = vsel %vm1247_vm10, %v1246_v54, %v1212_v62  ;;  %v1196_v32 = vpop.permute.xlu1 %1195 }
 0x20b   : > { %1792 = vmatmul.mubr.msk.bf16.gmra.mxu1 %vm1280_vm11, %v1279_v63  ;;  %v1263_v0 = vsel %vm1247_vm10, %v1230_v61, %v1196_v32 }
 0x20c   : > { %1784 = vmatmul.mubr.msk.bf16.gmra.mxu0 %vm1280_vm11, %v1263_v0 }
 0x28d   : > { %v1535_v57 = vpop.f32.mrf.mxu1 }
 0x28e   : > { %v1536_v15 = vadd.f32 %v1535_v57, %v3049_v41 }
 0x28f   : > { %v1537_v53 = vpop.f32.mrf.mxu1 }
 0x290   : > { %v1455_v31 = vpop.f32.mrf.mxu0  ;;  %1646 = vst [vmem:[%s3055_s8 + $0x100] sm:$0xff] %v1536_v15  ;;  %v1538_v17 = vadd.f32 %v1537_v53, %v3051_v11 }
 0x291   : > { %v1456_v19 = vadd.f32 %v1455_v31, %v3049_v41  ;;  %v1539_v59 = vpop.f32.mrf.mxu1 }
 0x292   : > { %v1457_v33 = vpop.f32.mrf.mxu0  ;;  %1647 = vst [vmem:[%s3055_s8 + $0x108] sm:$0xff] %v1538_v17  ;;  %v1540_v27 = vadd.f32 %v1539_v59, %v3049_v41 }
 0x293   : > { %1614 = vst [vmem:[%s3055_s8] sm:$0xff] %v1456_v19  ;;  %v1458_v1 = vadd.f32 %v1457_v33, %v3051_v11  ;;  %v1541_v23 = vpop.f32.mrf.mxu1 }
 0x294   : > { %v1459_v50 = vpop.f32.mrf.mxu0  ;;  %1648 = vst [vmem:[%s3055_s8 + $0x110] sm:$0xff] %v1540_v27  ;;  %v1542_v28 = vadd.f32 %v1541_v23, %v3051_v11 }
 0x295   : > { %1615 = vst [vmem:[%s3055_s8 + $0x8] sm:$0xff] %v1458_v1  ;;  %v1460_v48 = vadd.f32 %v1459_v50, %v3049_v41  ;;  %v1545_v22 = vpop.f32.mrf.mxu1 }
 0x296   : > { %v1461_v51 = vpop.f32.mrf.mxu0  ;;  %1649 = vst [vmem:[%s3055_s8 + $0x118] sm:$0xff] %v1542_v28  ;;  %v1546_v5 = vadd.f32 %v1545_v22, %v3049_v41 }
 0x297   : > { %1616 = vst [vmem:[%s3055_s8 + $0x10] sm:$0xff] %v1460_v48  ;;  %v1462_v12 = vadd.f32 %v1461_v51, %v3051_v11  ;;  %v1547_v42 = vpop.f32.mrf.mxu1 }
 0x298   : > { %1650 = vst [vmem:[%s3055_s8 + $0x120] sm:$0xff] %v1546_v5  ;;  %v1548_v4 = vadd.f32 %v1547_v42, %v3051_v11 }
 0x299   : > { %1617 = vst [vmem:[%s3055_s8 + $0x18] sm:$0xff] %v1462_v12  ;;  %v1465_v30 = vpop.f32.mrf.mxu0  ;;  %v1549_v21 = vpop.f32.mrf.mxu1 }
 0x29a   : > { %v1466_v39 = vadd.f32 %v1465_v30, %v3049_v41  ;;  %1651 = vst [vmem:[%s3055_s8 + $0x128] sm:$0xff] %v1548_v4  ;;  %v1550_v44 = vadd.f32 %v1549_v21, %v3049_v41 }
 0x29b   : > { %v1467_v13 = vpop.f32.mrf.mxu0  ;;  %v1551_v49 = vpop.f32.mrf.mxu1 }
 0x29c   : > { %1618 = vst [vmem:[%s3055_s8 + $0x20] sm:$0xff] %v1466_v39  ;;  %v1468_v58 = vadd.f32 %v1467_v13, %v3051_v11  ;;  %1652 = vst [vmem:[%s3055_s8 + $0x130] sm:$0xff] %v1550_v44  ;;  %v1552_v35 = vadd.f32 %v1551_v49, %v3051_v11 }
 0x29d   : > { %v1469_v47 = vpop.f32.mrf.mxu0  ;;  %v1555_v55 = vpop.f32.mrf.mxu1 }
 0x29e   : > { %1619 = vst [vmem:[%s3055_s8 + $0x28] sm:$0xff] %v1468_v58  ;;  %v1470_v45 = vadd.f32 %v1469_v47, %v3049_v41  ;;  %1653 = vst [vmem:[%s3055_s8 + $0x138] sm:$0xff] %v1552_v35  ;;  %v1556_v37 = vadd.f32 %v1555_v55, %v3049_v41 }
 0x29f   : > { %v1471_v20 = vpop.f32.mrf.mxu0  ;;  %v1557_v8 = vpop.f32.mrf.mxu1 }
 0x2a0   : > { %1620 = vst [vmem:[%s3055_s8 + $0x30] sm:$0xff] %v1470_v45  ;;  %v1472_v18 = vadd.f32 %v1471_v20, %v3051_v11  ;;  %1654 = vst [vmem:[%s3055_s8 + $0x140] sm:$0xff] %v1556_v37  ;;  %v1558_v40 = vadd.f32 %v1557_v8, %v3051_v11 }
 0x2a1   : > { %v1475_v2 = vpop.f32.mrf.mxu0  ;;  %v1559_v38 = vpop.f32.mrf.mxu1 }
 0x2a2   : > { %1621 = vst [vmem:[%s3055_s8 + $0x38] sm:$0xff] %v1472_v18  ;;  %v1476_v6 = vadd.f32 %v1475_v2, %v3049_v41  ;;  %1655 = vst [vmem:[%s3055_s8 + $0x148] sm:$0xff] %v1558_v40  ;;  %v1560_v52 = vadd.f32 %v1559_v38, %v3049_v41 }
 0x2a3   : > { %v1477_v24 = vpop.f32.mrf.mxu0  ;;  %v1561_v56 = vpop.f32.mrf.mxu1 }
 0x2a4   : > { %1622 = vst [vmem:[%s3055_s8 + $0x40] sm:$0xff] %v1476_v6  ;;  %v1478_v10 = vadd.f32 %v1477_v24, %v3051_v11  ;;  %1656 = vst [vmem:[%s3055_s8 + $0x150] sm:$0xff] %v1560_v52  ;;  %v1562_v46 = vadd.f32 %v1561_v56, %v3051_v11 }
 0x2a5   : > { %v1479_v16 = vpop.f32.mrf.mxu0 }
 0x2a6   : > { %1623 = vst [vmem:[%s3055_s8 + $0x48] sm:$0xff] %v1478_v10  ;;  %v1480_v9 = vadd.f32 %v1479_v16, %v3049_v41  ;;  %1657 = vst [vmem:[%s3055_s8 + $0x158] sm:$0xff] %v1562_v46 }
 0x2a7   : > { %v1481_v36 = vpop.f32.mrf.mxu0 }
 0x2a8   : > { %1624 = vst [vmem:[%s3055_s8 + $0x50] sm:$0xff] %v1480_v9  ;;  %v1482_v29 = vadd.f32 %v1481_v36, %v3051_v11 }
 0x2aa   : > { %1625 = vst [vmem:[%s3055_s8 + $0x58] sm:$0xff] %v1482_v29 }
 0x2ab   : > { %v1565_v25 = vpop.f32.mrf.mxu1 }
 0x2ac   : > { %v1566_v14 = vadd.f32 %v1565_v25, %v3049_v41  ;;  %v1485_v34 = vpop.f32.mrf.mxu0 }
 0x2ad   : > { %v1567_v54 = vpop.f32.mrf.mxu1  ;;  %v1486_v62 = vadd.f32 %v1485_v34, %v3049_v41 }
 0x2ae   : > { %1658 = vst [vmem:[%s3055_s8 + $0x160] sm:$0xff] %v1566_v14  ;;  %v1568_v63 = vadd.f32 %v1567_v54, %v3051_v11  ;;  %v1487_v61 = vpop.f32.mrf.mxu0 }
 0x2af   : > { %v1569_v32 = vpop.f32.mrf.mxu1  ;;  %1626 = vst [vmem:[%s3055_s8 + $0x60] sm:$0xff] %v1486_v62  ;;  %v1488_v0 = vadd.f32 %v1487_v61, %v3051_v11 }
 0x2b0   : > { %1659 = vst [vmem:[%s3055_s8 + $0x168] sm:$0xff] %v1568_v63  ;;  %v1570_v3 = vadd.f32 %v1569_v32, %v3049_v41  ;;  %v1489_v7 = vpop.f32.mrf.mxu0 }
 0x2b1   : > { %v1571_v26 = vpop.f32.mrf.mxu1  ;;  %1627 = vst [vmem:[%s3055_s8 + $0x68] sm:$0xff] %v1488_v0  ;;  %v1490_v60 = vadd.f32 %v1489_v7, %v3049_v41 }
 0x2b2   : > { %1660 = vst [vmem:[%s3055_s8 + $0x170] sm:$0xff] %v1570_v3  ;;  %v1572_v43 = vadd.f32 %v1571_v26, %v3051_v11  ;;  %v1491_v57 = vpop.f32.mrf.mxu0 }
 0x2b3   : > { %v1575_v15 = vpop.f32.mrf.mxu1  ;;  %1628 = vst [vmem:[%s3055_s8 + $0x70] sm:$0xff] %v1490_v60  ;;  %v1492_v31 = vadd.f32 %v1491_v57, %v3051_v11 }
 0x2b4   : > { %1661 = vst [vmem:[%s3055_s8 + $0x178] sm:$0xff] %v1572_v43  ;;  %v1576_v53 = vadd.f32 %v1575_v15, %v3049_v41  ;;  %v1495_v19 = vpop.f32.mrf.mxu0 }
 0x2b5   : > { %v1577_v17 = vpop.f32.mrf.mxu1  ;;  %1629 = vst [vmem:[%s3055_s8 + $0x78] sm:$0xff] %v1492_v31  ;;  %v1496_v33 = vadd.f32 %v1495_v19, %v3049_v41 }
 0x2b6   : > { %1662 = vst [vmem:[%s3055_s8 + $0x180] sm:$0xff] %v1576_v53  ;;  %v1578_v59 = vadd.f32 %v1577_v17, %v3051_v11  ;;  %v1497_v1 = vpop.f32.mrf.mxu0 }
 0x2b7   : > { %v1579_v27 = vpop.f32.mrf.mxu1  ;;  %1630 = vst [vmem:[%s3055_s8 + $0x80] sm:$0xff] %v1496_v33  ;;  %v1498_v50 = vadd.f32 %v1497_v1, %v3051_v11 }
 0x2b8   : > { %1663 = vst [vmem:[%s3055_s8 + $0x188] sm:$0xff] %v1578_v59  ;;  %v1580_v23 = vadd.f32 %v1579_v27, %v3049_v41  ;;  %v1499_v48 = vpop.f32.mrf.mxu0 }
 0x2b9   : > { %v1581_v28 = vpop.f32.mrf.mxu1  ;;  %1631 = vst [vmem:[%s3055_s8 + $0x88] sm:$0xff] %v1498_v50  ;;  %v1500_v51 = vadd.f32 %v1499_v48, %v3049_v41 }
 0x2ba   : > { %1664 = vst [vmem:[%s3055_s8 + $0x190] sm:$0xff] %v1580_v23  ;;  %v1582_v22 = vadd.f32 %v1581_v28, %v3051_v11  ;;  %v1501_v12 = vpop.f32.mrf.mxu0 }
 0x2bb   : > { %v1585_v5 = vpop.f32.mrf.mxu1  ;;  %1632 = vst [vmem:[%s3055_s8 + $0x90] sm:$0xff] %v1500_v51  ;;  %v1502_v42 = vadd.f32 %v1501_v12, %v3051_v11 }
 0x2bc   : > { %1665 = vst [vmem:[%s3055_s8 + $0x198] sm:$0xff] %v1582_v22  ;;  %v1586_v4 = vadd.f32 %v1585_v5, %v3049_v41  ;;  %v1505_v30 = vpop.f32.mrf.mxu0 }
 0x2bd   : > { %v1587_v21 = vpop.f32.mrf.mxu1  ;;  %1633 = vst [vmem:[%s3055_s8 + $0x98] sm:$0xff] %v1502_v42  ;;  %v1506_v39 = vadd.f32 %v1505_v30, %v3049_v41 }
 0x2be   : > { %1666 = vst [vmem:[%s3055_s8 + $0x1a0] sm:$0xff] %v1586_v4  ;;  %v1588_v44 = vadd.f32 %v1587_v21, %v3051_v11  ;;  %v1507_v13 = vpop.f32.mrf.mxu0 }
 0x2bf   : > { %v1589_v49 = vpop.f32.mrf.mxu1  ;;  %1634 = vst [vmem:[%s3055_s8 + $0xa0] sm:$0xff] %v1506_v39  ;;  %v1508_v58 = vadd.f32 %v1507_v13, %v3051_v11 }
 0x2c0   : > { %1667 = vst [vmem:[%s3055_s8 + $0x1a8] sm:$0xff] %v1588_v44  ;;  %v1590_v35 = vadd.f32 %v1589_v49, %v3049_v41  ;;  %v1509_v47 = vpop.f32.mrf.mxu0 }
 0x2c1   : > { %v1591_v55 = vpop.f32.mrf.mxu1  ;;  %1635 = vst [vmem:[%s3055_s8 + $0xa8] sm:$0xff] %v1508_v58  ;;  %v1510_v45 = vadd.f32 %v1509_v47, %v3049_v41 }
 0x2c2   : > { %1668 = vst [vmem:[%s3055_s8 + $0x1b0] sm:$0xff] %v1590_v35  ;;  %v1592_v37 = vadd.f32 %v1591_v55, %v3051_v11  ;;  %v1511_v20 = vpop.f32.mrf.mxu0 }
 0x2c3   : > { %v1595_v8 = vpop.f32.mrf.mxu1  ;;  %1636 = vst [vmem:[%s3055_s8 + $0xb0] sm:$0xff] %v1510_v45  ;;  %v1512_v18 = vadd.f32 %v1511_v20, %v3051_v11 }
 0x2c4   : > { %1669 = vst [vmem:[%s3055_s8 + $0x1b8] sm:$0xff] %v1592_v37  ;;  %v1596_v40 = vadd.f32 %v1595_v8, %v3049_v41  ;;  %v1515_v2 = vpop.f32.mrf.mxu0 }
 0x2c5   : > { %v1597_v38 = vpop.f32.mrf.mxu1  ;;  %1637 = vst [vmem:[%s3055_s8 + $0xb8] sm:$0xff] %v1512_v18  ;;  %v1516_v6 = vadd.f32 %v1515_v2, %v3049_v41 }
 0x2c6   : > { %1670 = vst [vmem:[%s3055_s8 + $0x1c0] sm:$0xff] %v1596_v40  ;;  %v1598_v52 = vadd.f32 %v1597_v38, %v3051_v11  ;;  %v1517_v24 = vpop.f32.mrf.mxu0 }
 0x2c7   : > { %v1599_v56 = vpop.f32.mrf.mxu1  ;;  %1638 = vst [vmem:[%s3055_s8 + $0xc0] sm:$0xff] %v1516_v6  ;;  %v1518_v10 = vadd.f32 %v1517_v24, %v3051_v11 }
 0x2c8   : > { %1671 = vst [vmem:[%s3055_s8 + $0x1c8] sm:$0xff] %v1598_v52  ;;  %v1600_v46 = vadd.f32 %v1599_v56, %v3049_v41  ;;  %v1519_v16 = vpop.f32.mrf.mxu0 }
 0x2c9   : > { %v1601_v9 = vpop.f32.mrf.mxu1  ;;  %1639 = vst [vmem:[%s3055_s8 + $0xc8] sm:$0xff] %v1518_v10  ;;  %v1520_v36 = vadd.f32 %v1519_v16, %v3049_v41 }
 0x2ca   : > { %1672 = vst [vmem:[%s3055_s8 + $0x1d0] sm:$0xff] %v1600_v46  ;;  %v1602_v29 = vadd.f32 %v1601_v9, %v3051_v11  ;;  %v1521_v25 = vpop.f32.mrf.mxu0 }
 0x2cb   : > { %v1605_v14 = vpop.f32.mrf.mxu1  ;;  %1640 = vst [vmem:[%s3055_s8 + $0xd0] sm:$0xff] %v1520_v36  ;;  %v1522_v34 = vadd.f32 %v1521_v25, %v3051_v11 }
 0x2cc   : > { %1673 = vst [vmem:[%s3055_s8 + $0x1d8] sm:$0xff] %v1602_v29  ;;  %v1606_v54 = vadd.f32 %v1605_v14, %v3049_v41  ;;  %v1525_v62 = vpop.f32.mrf.mxu0 }
 0x2cd   : > { %v1607_v63 = vpop.f32.mrf.mxu1  ;;  %1641 = vst [vmem:[%s3055_s8 + $0xd8] sm:$0xff] %v1522_v34  ;;  %v1526_v61 = vadd.f32 %v1525_v62, %v3049_v41 }
 0x2ce   : > { %1674 = vst [vmem:[%s3055_s8 + $0x1e0] sm:$0xff] %v1606_v54  ;;  %v1608_v32 = vadd.f32 %v1607_v63, %v3051_v11  ;;  %v1527_v0 = vpop.f32.mrf.mxu0 }
 0x2cf   : > { %v1609_v3 = vpop.f32.mrf.mxu1  ;;  %1642 = vst [vmem:[%s3055_s8 + $0xe0] sm:$0xff] %v1526_v61  ;;  %v1528_v7 = vadd.f32 %v1527_v0, %v3051_v11 }
 0x2d0   : > { %1675 = vst [vmem:[%s3055_s8 + $0x1e8] sm:$0xff] %v1608_v32  ;;  %v1610_v26 = vadd.f32 %v1609_v3, %v3049_v41  ;;  %v1529_v60 = vpop.f32.mrf.mxu0 }
 0x2d1   : > { %v1611_v43 = vpop.f32.mrf.mxu1  ;;  %1643 = vst [vmem:[%s3055_s8 + $0xe8] sm:$0xff] %v1528_v7  ;;  %v1530_v57 = vadd.f32 %v1529_v60, %v3049_v41 }
 0x2d2   : > { %1676 = vst [vmem:[%s3055_s8 + $0x1f0] sm:$0xff] %v1610_v26  ;;  %v1612_v15 = vadd.f32 %v1611_v43, %v3051_v11  ;;  %v1531_v31 = vpop.f32.mrf.mxu0 }
 0x2d3   : > { %1644 = vst [vmem:[%s3055_s8 + $0xf0] sm:$0xff] %v1530_v57  ;;  %v1532_v53 = vadd.f32 %v1531_v31, %v3051_v11 }
 0x2d4   : > { %1677 = vst [vmem:[%s3055_s8 + $0x1f8] sm:$0xff] %v1612_v15 }
 0x2d5   : > { %1645 = vst [vmem:[%s3055_s8 + $0xf8] sm:$0xff] %v1532_v53 }
 0x2d6   : > { %1946 = shalt.err (!%p1943_p3)
}
 0x2d7   : > { %s1947_s27 = scalar_lea.hbm %s3184_s19, 8192  ;;  %s1951_s30 = scalar_lea.hbm %s3237_s3, 16384 }
 0x2d8   : > { %p1948_p4 = scmp.ne.s32.totalorder %s3184_s19, %s1947_s27  ;;  %p1952_p9 = scmp.lt.s32.totalorder %s3184_s19, %s3237_s3 }
 0x2d9   : > { %p1953_p10 = scmp.lt.s32.totalorder %s1951_s30, %s1947_s27 }
 0x2da   : > { %p1949_p7 = pnand %p1948_p4, %p2063_p5 }
 0x2db   : > { %p1954_p11 = por %p1953_p10, %p1952_p9 }
 0x2dc   : > { %p1950_p8 = pneg %p1949_p7 }
 0x2de   : > { %p1955_p12 = pnand %p1954_p11, %p1950_p8 }
 0x2e0   : > { %1958 = shalt.err (!%p1955_p12)
}
 0x2e1   : > { %s2003_s6 = smov 256   ;;  %s2004_s7 = smov 16  }
 0x2e2   : > { %1816 = dma.vmem_to_hbm [thread:$0]  (%p2063_p5), %s3186_s10, 8192, %s3184_s19, %s3194_s16, %s2003_s6, %s2003_s6, %s2004_s7  }
 0x2e3 PF: > { %p1822_p13 = scmp.ge.s32.totalorder %s1993_s15, 2  ;;  %s1707_s8 = sand.u32 1, %s1981_s12  }
 0x2e4   : > { %s1708_s9 = scalar_lea.sflag [#allocation3], %s1707_s8 }
 0x2e5   : > { %p1819_p0 = pnand %p1822_p13, %p2067_p6 }
 0x2e7   : > { %p1820_p1 = pneg %p1819_p0 }
 0x2e9   : > { %1976 = dma.done.wait (%p1820_p1), %s1708_s9, 8192  }
 0x2ea   : > { %1978 = vsyncadd (%p1820_p1), %s1708_s9, 4294959104  ;;  %p13_p2 = scmp.ge.s32.totalorder %s2050_s18, 4   ;;  %s3278_s12 = smov %s1985_s13 }
 0x2eb   : > { %s3279_s13 = smov %s1989_s14  ;;  %s3280_s14 = smov %s2061_s21 }
 0x2ec   : > { %s3281_s15 = smov %s2050_s18  ;;  %15 = sbr.rel (!%p13_p2) target bundleno = 3 (0x3), region = 67 }
 0x2f1   :  { %1713 = vsyncpa [#allocation3], 1 }
 0x2f2   :  { %1715 = vsyncpa [#allocation3 + $0x1], 1 }

</bundles_post_ra>
